<compile_context>
chip_gen: v6e
topology: v6e:2x2x1
jax: 0.10.0
libtpu: 0.0.40
codegen_flags: <defaults>
</compile_context>

<pallas_src>
import math

import jax
import jax.numpy as jnp
from jax.experimental import pallas as pl
from jax.experimental.pallas import tpu as pltpu

# ---------------------------------------------------------------- config ----
D_MODEL = 32          # layer.size
N_HEADS = 4
D_K = D_MODEL // N_HEADS
D_FF = 64
N_LAYERS = 2
EPS = 1e-6
NEG_INF = -1e9


# ---------------------------------------------------------------- kernel ----
def _layernorm(x, a, b):
    """PyTorch-spec LayerNorm: unbiased std, eps added to the std."""
    mean = jnp.mean(x, axis=-1, keepdims=True)
    var = jnp.sum((x - mean) ** 2, axis=-1, keepdims=True) / (x.shape[-1] - 1)
    std = jnp.sqrt(var)
    return a * (x - mean) / (std + EPS) + b


def encoder_kernel(x_ref, bias_ref,
                   ln1a_ref, ln1b_ref,
                   wq_ref, wk_ref, wv_ref, bq_ref, bk_ref, bv_ref,
                   wo_ref, bo_ref,
                   ln2a_ref, ln2b_ref,
                   w1_ref, b1_ref, w2_ref, b2_ref,
                   fa_ref, fb_ref,
                   o_ref):
    """One grid step = one batch element: all N layers + final LayerNorm.

    x_ref:    (1, S, D)  activations of this sequence
    bias_ref: (1, 1, S)  additive key-padding bias (0 = attend, -1e9 = masked)
    weights:  stacked along a leading layer axis, resident in VMEM.
    """
    x = x_ref[0]                       # (S, D)
    bias = bias_ref[0]                 # (1, S)
    S = x.shape[0]
    scale = 1.0 / math.sqrt(D_K)

    for l in range(N_LAYERS):          # static unroll over layers
        # ---- sublayer 1: x + SelfAttn(LayerNorm(x)) -------------------------
        y = _layernorm(x, ln1a_ref[l], ln1b_ref[l])            # (S, D)
        yb = jnp.broadcast_to(y, (N_HEADS, S, D_MODEL))        # (H, S, D)

        # head-batched projections: no lane slicing, no concatenation
        q = jnp.einsum('hsd,hdk->hsk', yb, wq_ref[l],
                       preferred_element_type=jnp.float32) + bq_ref[l]
        k = jnp.einsum('hsd,hdk->hsk', yb, wk_ref[l],
                       preferred_element_type=jnp.float32) + bk_ref[l]
        v = jnp.einsum('hsd,hdk->hsk', yb, wv_ref[l],
                       preferred_element_type=jnp.float32) + bv_ref[l]

        # all-heads scores, last-dim contraction (no k.T transpose)
        s = jnp.einsum('hqd,hkd->hqk', q, k,
                       preferred_element_type=jnp.float32) * scale   # (H,S,S)
        s = s + bias                                    # single mask add/layer
        s = s - jnp.max(s, axis=-1, keepdims=True)
        p = jnp.exp(s)
        p = p / jnp.sum(p, axis=-1, keepdims=True)      # exact softmax divide

        heads = jnp.einsum('hqk,hkd->hqd', p, v,
                           preferred_element_type=jnp.float32)       # (H,S,Dk)
        proj = jnp.einsum('hqd,hdm->hqm', heads, wo_ref[l],
                          preferred_element_type=jnp.float32)        # (H,S,D)
        x = x + jnp.sum(proj, axis=0) + bo_ref[l]

        # ---- sublayer 2: x + FFN(LayerNorm(x)) ------------------------------
        y = _layernorm(x, ln2a_ref[l], ln2b_ref[l])
        h1 = jnp.maximum(
            jnp.dot(y, w1_ref[l], preferred_element_type=jnp.float32)
            + b1_ref[l], 0.0)
        x = x + (jnp.dot(h1, w2_ref[l], preferred_element_type=jnp.float32)
                 + b2_ref[l])

    # ---- final LayerNorm, single store --------------------------------------
    o_ref[0] = _layernorm(x, fa_ref[...], fb_ref[...])


# ---------------------------------------------------------------- wrapper ---
def encoder_forward(x, mask, params):
    """Encoder.forward(x, mask).  x: (B, S, D), mask: (B, 1, S), 1 = attend."""
    B, S, D = x.shape
    assert D == D_MODEL

    # O(S) additive key-padding bias per sequence (replaces old (T,T) mask).
    bias = jnp.where(mask != 0, 0.0, NEG_INF).astype(jnp.float32)   # (B, 1, S)

    weight_names = ["ln1_a", "ln1_b",
                    "wq", "wk", "wv", "bq", "bk", "bv", "wo", "bo",
                    "ln2_a", "ln2_b", "w1", "b1", "w2", "b2",
                    "fa", "fb"]
    weights = [params[n] for n in weight_names]

    def resident(arr):
        # full-array block, constant block index -> DMA'd once, stays resident
        return pl.BlockSpec(arr.shape, lambda b, _z=(0,) * arr.ndim: _z)

    in_specs = ([pl.BlockSpec((1, S, D), lambda b: (b, 0, 0)),
                 pl.BlockSpec((1, 1, S), lambda b: (b, 0, 0))]
                + [resident(w) for w in weights])
    out_spec = pl.BlockSpec((1, S, D), lambda b: (b, 0, 0))

    # Advisory cost estimate (matmul flops, softmax exps, operand bytes).
    mm_flops = 2 * B * N_LAYERS * (
        3 * S * D * D                      # Q/K/V projections
        + 2 * N_HEADS * S * S * D_K        # scores + P@V
        + S * D * D                        # Wo
        + 2 * S * D * D_FF)                # FFN
    weight_bytes = sum(int(w.size) * w.dtype.itemsize for w in weights)
    cost = pl.CostEstimate(
        flops=int(mm_flops),
        transcendentals=int(B * N_LAYERS * N_HEADS * S * S),
        bytes_accessed=int(2 * x.size * 4 + bias.size * 4 + weight_bytes))

    out = pl.pallas_call(
        encoder_kernel,
        out_shape=jax.ShapeDtypeStruct((B, S, D), jnp.float32),
        grid_spec=pltpu.PrefetchScalarGridSpec(
            num_scalar_prefetch=0,
            grid=(B,),
            in_specs=in_specs,
            out_specs=out_spec),
        compiler_params=pltpu.CompilerParams(
            dimension_semantics=("parallel",),   # v7x: batch split across TCs
            vmem_limit_bytes=32 * 1024 * 1024),
        cost_estimate=cost,
    )(x, bias, *weights)
    return out


# ---------------------------------------------------------------- params ----
def init_params(key):
    def uniform(k, shape, fan_in):
        s = 1.0 / math.sqrt(fan_in)
        return jax.random.uniform(k, shape, jnp.float32, -s, s)

    names = ["wq", "wk", "wv", "bq", "bk", "bv", "wo", "bo",
             "w1", "b1", "w2", "b2"]
    stacks = {n: [] for n in names}
    for _ in range(N_LAYERS):
        key, kq, kk, kv, ko, k1, k2 = jax.random.split(key, 7)
        key, kbq, kbk, kbv, kbo, kb1, kb2 = jax.random.split(key, 7)
        # head-major projection weights: (H, D, D_K)
        for nm, kw in (("wq", kq), ("wk", kk), ("wv", kv)):
            w = uniform(kw, (D_MODEL, D_MODEL), D_MODEL)
            stacks[nm].append(w.reshape(D_MODEL, N_HEADS, D_K).transpose(1, 0, 2))
        for nm, kb in (("bq", kbq), ("bk", kbk), ("bv", kbv)):
            b = uniform(kb, (D_MODEL,), D_MODEL)
            stacks[nm].append(b.reshape(N_HEADS, 1, D_K))
        # output projection: rows partitioned by head -> (H, D_K, D)
        stacks["wo"].append(uniform(ko, (D_MODEL, D_MODEL), D_MODEL)
                            .reshape(N_HEADS, D_K, D_MODEL))
        stacks["bo"].append(uniform(kbo, (1, D_MODEL), D_MODEL))
        # position-wise FFN
        stacks["w1"].append(uniform(k1, (D_MODEL, D_FF), D_MODEL))
        stacks["b1"].append(uniform(kb1, (1, D_FF), D_MODEL))
        stacks["w2"].append(uniform(k2, (D_FF, D_MODEL), D_FF))
        stacks["b2"].append(uniform(kb2, (1, D_MODEL), D_FF))

    params = {n: jnp.stack(stacks[n]) for n in names}
    params.update(
        ln1_a=jnp.ones((N_LAYERS, 1, D_MODEL), jnp.float32),
        ln1_b=jnp.zeros((N_LAYERS, 1, D_MODEL), jnp.float32),
        ln2_a=jnp.ones((N_LAYERS, 1, D_MODEL), jnp.float32),
        ln2_b=jnp.zeros((N_LAYERS, 1, D_MODEL), jnp.float32),
        fa=jnp.ones((1, D_MODEL), jnp.float32),
        fb=jnp.zeros((1, D_MODEL), jnp.float32),
    )
    return params, key


# ------------------------------------------------------------------ main ----
if __name__ == "__main__":
    B, S = 2, 8
    key = jax.random.PRNGKey(0)
    params, key = init_params(key)

    key, kx = jax.random.split(key)
    x = jax.random.normal(kx, (B, S, D_MODEL), jnp.float32)

    # mask: batch 0 fully visible, batch 1 has the last two key positions masked.
    mask = jnp.ones((B, 1, S), jnp.int32)
    mask = mask.at[1, 0, -2:].set(0)

    fwd = jax.jit(encoder_forward)
    out = jax.block_until_ready(fwd(x, mask, params))
    assert out.shape == (B, S, D_MODEL) and out.dtype == jnp.float32
    assert bool(jnp.all(jnp.isfinite(out)))
    print("KERNEL_OK")
</pallas_src>

<mosaic_0001>
module attributes {stable_mosaic.version = 11 : i64} {
  func.func @encoder_kernel(%arg0: i32, %arg1: memref<1x8x32xf32, #tpu.memory_space<vmem>>, %arg2: memref<1x1x8xf32, #tpu.memory_space<vmem>>, %arg3: memref<2x1x32xf32, #tpu.memory_space<vmem>>, %arg4: memref<2x1x32xf32, #tpu.memory_space<vmem>>, %arg5: memref<2x4x32x8xf32, #tpu.memory_space<vmem>>, %arg6: memref<2x4x32x8xf32, #tpu.memory_space<vmem>>, %arg7: memref<2x4x32x8xf32, #tpu.memory_space<vmem>>, %arg8: memref<2x4x1x8xf32, #tpu.memory_space<vmem>>, %arg9: memref<2x4x1x8xf32, #tpu.memory_space<vmem>>, %arg10: memref<2x4x1x8xf32, #tpu.memory_space<vmem>>, %arg11: memref<2x4x8x32xf32, #tpu.memory_space<vmem>>, %arg12: memref<2x1x32xf32, #tpu.memory_space<vmem>>, %arg13: memref<2x1x32xf32, #tpu.memory_space<vmem>>, %arg14: memref<2x1x32xf32, #tpu.memory_space<vmem>>, %arg15: memref<2x32x64xf32, #tpu.memory_space<vmem>>, %arg16: memref<2x1x64xf32, #tpu.memory_space<vmem>>, %arg17: memref<2x64x32xf32, #tpu.memory_space<vmem>>, %arg18: memref<2x1x32xf32, #tpu.memory_space<vmem>>, %arg19: memref<1x32xf32, #tpu.memory_space<vmem>>, %arg20: memref<1x32xf32, #tpu.memory_space<vmem>>, %arg21: memref<1x8x32xf32, #tpu.memory_space<vmem>>) attributes {dimension_semantics = [#tpu.dimension_semantics<parallel>], iteration_bounds = array<i64: 2>, scalar_prefetch = 0 : i64, scratch_operands = 0 : i64, tpu.core_type = #tpu.core_type<tc>, window_params = [{transform_indices = @transform_0, window_bounds = array<i64: 1, 8, 32>}, {transform_indices = @transform_1, window_bounds = array<i64: 1, 1, 8>}, {pipeline_mode = #tpu.pipeline_mode<synchronous>, transform_indices = @transform_2, window_bounds = array<i64: 2, 1, 32>}, {pipeline_mode = #tpu.pipeline_mode<synchronous>, transform_indices = @transform_3, window_bounds = array<i64: 2, 1, 32>}, {pipeline_mode = #tpu.pipeline_mode<synchronous>, transform_indices = @transform_4, window_bounds = array<i64: 2, 4, 32, 8>}, {pipeline_mode = #tpu.pipeline_mode<synchronous>, transform_indices = @transform_5, window_bounds = array<i64: 2, 4, 32, 8>}, {pipeline_mode = #tpu.pipeline_mode<synchronous>, transform_indices = @transform_6, window_bounds = array<i64: 2, 4, 32, 8>}, {pipeline_mode = #tpu.pipeline_mode<synchronous>, transform_indices = @transform_7, window_bounds = array<i64: 2, 4, 1, 8>}, {pipeline_mode = #tpu.pipeline_mode<synchronous>, transform_indices = @transform_8, window_bounds = array<i64: 2, 4, 1, 8>}, {pipeline_mode = #tpu.pipeline_mode<synchronous>, transform_indices = @transform_9, window_bounds = array<i64: 2, 4, 1, 8>}, {pipeline_mode = #tpu.pipeline_mode<synchronous>, transform_indices = @transform_10, window_bounds = array<i64: 2, 4, 8, 32>}, {pipeline_mode = #tpu.pipeline_mode<synchronous>, transform_indices = @transform_11, window_bounds = array<i64: 2, 1, 32>}, {pipeline_mode = #tpu.pipeline_mode<synchronous>, transform_indices = @transform_12, window_bounds = array<i64: 2, 1, 32>}, {pipeline_mode = #tpu.pipeline_mode<synchronous>, transform_indices = @transform_13, window_bounds = array<i64: 2, 1, 32>}, {pipeline_mode = #tpu.pipeline_mode<synchronous>, transform_indices = @transform_14, window_bounds = array<i64: 2, 32, 64>}, {pipeline_mode = #tpu.pipeline_mode<synchronous>, transform_indices = @transform_15, window_bounds = array<i64: 2, 1, 64>}, {pipeline_mode = #tpu.pipeline_mode<synchronous>, transform_indices = @transform_16, window_bounds = array<i64: 2, 64, 32>}, {pipeline_mode = #tpu.pipeline_mode<synchronous>, transform_indices = @transform_17, window_bounds = array<i64: 2, 1, 32>}, {pipeline_mode = #tpu.pipeline_mode<synchronous>, transform_indices = @transform_18, window_bounds = array<i64: 1, 32>}, {pipeline_mode = #tpu.pipeline_mode<synchronous>, transform_indices = @transform_19, window_bounds = array<i64: 1, 32>}, {transform_indices = @transform_20, window_bounds = array<i64: 1, 8, 32>}]} {
    %c0 = arith.constant 0 : index
    %c0_0 = arith.constant 0 : index
    %c0_1 = arith.constant 0 : index
    %0 = vector.load %arg1[%c0, %c0_0, %c0_1] : memref<1x8x32xf32, #tpu.memory_space<vmem>>, vector<1x8x32xf32>
    %1 = vector.shape_cast %0 : vector<1x8x32xf32> to vector<8x32xf32>
    %c0_2 = arith.constant 0 : index
    %c0_3 = arith.constant 0 : index
    %c0_4 = arith.constant 0 : index
    %2 = vector.load %arg2[%c0_2, %c0_3, %c0_4] : memref<1x1x8xf32, #tpu.memory_space<vmem>>, vector<1x1x8xf32>
    %3 = vector.shape_cast %2 : vector<1x1x8xf32> to vector<1x8xf32>
    %c0_5 = arith.constant 0 : index
    %c0_6 = arith.constant 0 : index
    %c0_7 = arith.constant 0 : index
    %4 = vector.load %arg3[%c0_5, %c0_6, %c0_7] : memref<2x1x32xf32, #tpu.memory_space<vmem>>, vector<1x1x32xf32>
    %5 = vector.shape_cast %4 : vector<1x1x32xf32> to vector<1x32xf32>
    %c0_8 = arith.constant 0 : index
    %c0_9 = arith.constant 0 : index
    %c0_10 = arith.constant 0 : index
    %6 = vector.load %arg4[%c0_8, %c0_9, %c0_10] : memref<2x1x32xf32, #tpu.memory_space<vmem>>, vector<1x1x32xf32>
    %7 = vector.shape_cast %6 : vector<1x1x32xf32> to vector<1x32xf32>
    %cst = arith.constant dense<0.000000e+00> : vector<8xf32>
    %8 = vector.multi_reduction <add>, %1, %cst [1] : vector<8x32xf32> to vector<8xf32>
    %9 = vector.shape_cast %8 : vector<8xf32> to vector<8x1xf32>
    %cst_11 = arith.constant 3.200000e+01 : f32
    %10 = vector.broadcast %cst_11 : f32 to vector<8x1xf32>
    %11 = arith.divf %9, %10 : vector<8x1xf32>
    %12 = vector.broadcast %11 : vector<8x1xf32> to vector<8x32xf32>
    %13 = arith.subf %1, %12 : vector<8x32xf32>
    %14 = arith.mulf %13, %13 : vector<8x32xf32>
    %cst_12 = arith.constant dense<0.000000e+00> : vector<8xf32>
    %15 = vector.multi_reduction <add>, %14, %cst_12 [1] : vector<8x32xf32> to vector<8xf32>
    %16 = vector.shape_cast %15 : vector<8xf32> to vector<8x1xf32>
    %cst_13 = arith.constant 3.100000e+01 : f32
    %17 = vector.broadcast %cst_13 : f32 to vector<8x1xf32>
    %18 = arith.divf %16, %17 : vector<8x1xf32>
    %19 = math.sqrt %18 : vector<8x1xf32>
    %20 = vector.broadcast %11 : vector<8x1xf32> to vector<8x32xf32>
    %21 = arith.subf %1, %20 : vector<8x32xf32>
    %22 = vector.broadcast %5 : vector<1x32xf32> to vector<8x32xf32>
    %23 = arith.mulf %22, %21 : vector<8x32xf32>
    %cst_14 = arith.constant 9.99999997E-7 : f32
    %24 = vector.broadcast %cst_14 : f32 to vector<8x1xf32>
    %25 = arith.addf %19, %24 : vector<8x1xf32>
    %26 = vector.broadcast %25 : vector<8x1xf32> to vector<8x32xf32>
    %27 = arith.divf %23, %26 : vector<8x32xf32>
    %28 = vector.broadcast %7 : vector<1x32xf32> to vector<8x32xf32>
    %29 = arith.addf %27, %28 : vector<8x32xf32>
    %30 = vector.shape_cast %29 : vector<8x32xf32> to vector<1x8x32xf32>
    %31 = vector.broadcast %30 : vector<1x8x32xf32> to vector<4x8x32xf32>
    %c0_15 = arith.constant 0 : index
    %c0_16 = arith.constant 0 : index
    %c0_17 = arith.constant 0 : index
    %c0_18 = arith.constant 0 : index
    %32 = vector.load %arg5[%c0_15, %c0_16, %c0_17, %c0_18] : memref<2x4x32x8xf32, #tpu.memory_space<vmem>>, vector<1x4x32x8xf32>
    %33 = vector.shape_cast %32 : vector<1x4x32x8xf32> to vector<4x32x8xf32>
    "tpu.trace_start"() <{level = 10 : i32, message = "hsd,hdk->hsk"}> : () -> ()
    %cst_19 = arith.constant dense<0.000000e+00> : vector<4x8x8xf32>
    %34 = tpu.matmul %31, %33, %cst_19 {dimension_numbers = #tpu.dot_dimension_numbers<[2], [1], [1], [2], [0, 0, 0, 1, 1, 2], [0], [0]>} : vector<4x8x32xf32>, vector<4x32x8xf32>, vector<4x8x8xf32> -> vector<4x8x8xf32>
    "tpu.trace_stop"() : () -> ()
    %c0_20 = arith.constant 0 : index
    %c0_21 = arith.constant 0 : index
    %c0_22 = arith.constant 0 : index
    %c0_23 = arith.constant 0 : index
    %35 = vector.load %arg8[%c0_20, %c0_21, %c0_22, %c0_23] : memref<2x4x1x8xf32, #tpu.memory_space<vmem>>, vector<1x4x1x8xf32>
    %36 = vector.shape_cast %35 : vector<1x4x1x8xf32> to vector<4x1x8xf32>
    %37 = vector.broadcast %36 : vector<4x1x8xf32> to vector<4x8x8xf32>
    %38 = arith.addf %34, %37 : vector<4x8x8xf32>
    %c0_24 = arith.constant 0 : index
    %c0_25 = arith.constant 0 : index
    %c0_26 = arith.constant 0 : index
    %c0_27 = arith.constant 0 : index
    %39 = vector.load %arg6[%c0_24, %c0_25, %c0_26, %c0_27] : memref<2x4x32x8xf32, #tpu.memory_space<vmem>>, vector<1x4x32x8xf32>
    %40 = vector.shape_cast %39 : vector<1x4x32x8xf32> to vector<4x32x8xf32>
    "tpu.trace_start"() <{level = 10 : i32, message = "hsd,hdk->hsk"}> : () -> ()
    %cst_28 = arith.constant dense<0.000000e+00> : vector<4x8x8xf32>
    %41 = tpu.matmul %31, %40, %cst_28 {dimension_numbers = #tpu.dot_dimension_numbers<[2], [1], [1], [2], [0, 0, 0, 1, 1, 2], [0], [0]>} : vector<4x8x32xf32>, vector<4x32x8xf32>, vector<4x8x8xf32> -> vector<4x8x8xf32>
    "tpu.trace_stop"() : () -> ()
    %c0_29 = arith.constant 0 : index
    %c0_30 = arith.constant 0 : index
    %c0_31 = arith.constant 0 : index
    %c0_32 = arith.constant 0 : index
    %42 = vector.load %arg9[%c0_29, %c0_30, %c0_31, %c0_32] : memref<2x4x1x8xf32, #tpu.memory_space<vmem>>, vector<1x4x1x8xf32>
    %43 = vector.shape_cast %42 : vector<1x4x1x8xf32> to vector<4x1x8xf32>
    %44 = vector.broadcast %43 : vector<4x1x8xf32> to vector<4x8x8xf32>
    %45 = arith.addf %41, %44 : vector<4x8x8xf32>
    %c0_33 = arith.constant 0 : index
    %c0_34 = arith.constant 0 : index
    %c0_35 = arith.constant 0 : index
    %c0_36 = arith.constant 0 : index
    %46 = vector.load %arg7[%c0_33, %c0_34, %c0_35, %c0_36] : memref<2x4x32x8xf32, #tpu.memory_space<vmem>>, vector<1x4x32x8xf32>
    %47 = vector.shape_cast %46 : vector<1x4x32x8xf32> to vector<4x32x8xf32>
    "tpu.trace_start"() <{level = 10 : i32, message = "hsd,hdk->hsk"}> : () -> ()
    %cst_37 = arith.constant dense<0.000000e+00> : vector<4x8x8xf32>
    %48 = tpu.matmul %31, %47, %cst_37 {dimension_numbers = #tpu.dot_dimension_numbers<[2], [1], [1], [2], [0, 0, 0, 1, 1, 2], [0], [0]>} : vector<4x8x32xf32>, vector<4x32x8xf32>, vector<4x8x8xf32> -> vector<4x8x8xf32>
    "tpu.trace_stop"() : () -> ()
    %c0_38 = arith.constant 0 : index
    %c0_39 = arith.constant 0 : index
    %c0_40 = arith.constant 0 : index
    %c0_41 = arith.constant 0 : index
    %49 = vector.load %arg10[%c0_38, %c0_39, %c0_40, %c0_41] : memref<2x4x1x8xf32, #tpu.memory_space<vmem>>, vector<1x4x1x8xf32>
    %50 = vector.shape_cast %49 : vector<1x4x1x8xf32> to vector<4x1x8xf32>
    %51 = vector.broadcast %50 : vector<4x1x8xf32> to vector<4x8x8xf32>
    %52 = arith.addf %48, %51 : vector<4x8x8xf32>
    "tpu.trace_start"() <{level = 10 : i32, message = "hqd,hkd->hqk"}> : () -> ()
    %cst_42 = arith.constant dense<0.000000e+00> : vector<4x8x8xf32>
    %53 = tpu.matmul %38, %45, %cst_42 {dimension_numbers = #tpu.dot_dimension_numbers<[2], [2], [1], [1], [0, 0, 0, 1, 1, 1], [0], [0]>} : vector<4x8x8xf32>, vector<4x8x8xf32>, vector<4x8x8xf32> -> vector<4x8x8xf32>
    "tpu.trace_stop"() : () -> ()
    %cst_43 = arith.constant 0.353553385 : f32
    %54 = vector.broadcast %cst_43 : f32 to vector<4x8x8xf32>
    %55 = arith.mulf %53, %54 : vector<4x8x8xf32>
    %56 = vector.shape_cast %3 : vector<1x8xf32> to vector<1x1x8xf32>
    %57 = vector.broadcast %56 : vector<1x1x8xf32> to vector<4x8x8xf32>
    %58 = arith.addf %55, %57 : vector<4x8x8xf32>
    %cst_44 = arith.constant dense<0xFF800000> : vector<4x8xf32>
    %59 = vector.multi_reduction <maximumf>, %58, %cst_44 [2] : vector<4x8x8xf32> to vector<4x8xf32>
    %60 = vector.shape_cast %59 : vector<4x8xf32> to vector<4x8x1xf32>
    %61 = vector.broadcast %60 : vector<4x8x1xf32> to vector<4x8x8xf32>
    %62 = arith.subf %58, %61 : vector<4x8x8xf32>
    %63 = math.exp %62 : vector<4x8x8xf32>
    %cst_45 = arith.constant dense<0.000000e+00> : vector<4x8xf32>
    %64 = vector.multi_reduction <add>, %63, %cst_45 [2] : vector<4x8x8xf32> to vector<4x8xf32>
    %65 = vector.shape_cast %64 : vector<4x8xf32> to vector<4x8x1xf32>
    %66 = vector.broadcast %65 : vector<4x8x1xf32> to vector<4x8x8xf32>
    %67 = arith.divf %63, %66 : vector<4x8x8xf32>
    "tpu.trace_start"() <{level = 10 : i32, message = "hqk,hkd->hqd"}> : () -> ()
    %cst_46 = arith.constant dense<0.000000e+00> : vector<4x8x8xf32>
    %68 = tpu.matmul %67, %52, %cst_46 {dimension_numbers = #tpu.dot_dimension_numbers<[2], [1], [1], [2], [0, 0, 0, 1, 1, 2], [0], [0]>} : vector<4x8x8xf32>, vector<4x8x8xf32>, vector<4x8x8xf32> -> vector<4x8x8xf32>
    "tpu.trace_stop"() : () -> ()
    %c0_47 = arith.constant 0 : index
    %c0_48 = arith.constant 0 : index
    %c0_49 = arith.constant 0 : index
    %c0_50 = arith.constant 0 : index
    %69 = vector.load %arg11[%c0_47, %c0_48, %c0_49, %c0_50] : memref<2x4x8x32xf32, #tpu.memory_space<vmem>>, vector<1x4x8x32xf32>
    %70 = vector.shape_cast %69 : vector<1x4x8x32xf32> to vector<4x8x32xf32>
    "tpu.trace_start"() <{level = 10 : i32, message = "hqd,hdm->hqm"}> : () -> ()
    %cst_51 = arith.constant dense<0.000000e+00> : vector<4x8x32xf32>
    %71 = tpu.matmul %68, %70, %cst_51 {dimension_numbers = #tpu.dot_dimension_numbers<[2], [1], [1], [2], [0, 0, 0, 1, 1, 2], [0], [0]>} : vector<4x8x8xf32>, vector<4x8x32xf32>, vector<4x8x32xf32> -> vector<4x8x32xf32>
    "tpu.trace_stop"() : () -> ()
    %cst_52 = arith.constant dense<0.000000e+00> : vector<8x32xf32>
    %72 = vector.multi_reduction <add>, %71, %cst_52 [0] : vector<4x8x32xf32> to vector<8x32xf32>
    %73 = arith.addf %1, %72 : vector<8x32xf32>
    %c0_53 = arith.constant 0 : index
    %c0_54 = arith.constant 0 : index
    %c0_55 = arith.constant 0 : index
    %74 = vector.load %arg12[%c0_53, %c0_54, %c0_55] : memref<2x1x32xf32, #tpu.memory_space<vmem>>, vector<1x1x32xf32>
    %75 = vector.shape_cast %74 : vector<1x1x32xf32> to vector<1x32xf32>
    %76 = vector.broadcast %75 : vector<1x32xf32> to vector<8x32xf32>
    %77 = arith.addf %73, %76 : vector<8x32xf32>
    %c0_56 = arith.constant 0 : index
    %c0_57 = arith.constant 0 : index
    %c0_58 = arith.constant 0 : index
    %78 = vector.load %arg13[%c0_56, %c0_57, %c0_58] : memref<2x1x32xf32, #tpu.memory_space<vmem>>, vector<1x1x32xf32>
    %79 = vector.shape_cast %78 : vector<1x1x32xf32> to vector<1x32xf32>
    %c0_59 = arith.constant 0 : index
    %c0_60 = arith.constant 0 : index
    %c0_61 = arith.constant 0 : index
    %80 = vector.load %arg14[%c0_59, %c0_60, %c0_61] : memref<2x1x32xf32, #tpu.memory_space<vmem>>, vector<1x1x32xf32>
    %81 = vector.shape_cast %80 : vector<1x1x32xf32> to vector<1x32xf32>
    %cst_62 = arith.constant dense<0.000000e+00> : vector<8xf32>
    %82 = vector.multi_reduction <add>, %77, %cst_62 [1] : vector<8x32xf32> to vector<8xf32>
    %83 = vector.shape_cast %82 : vector<8xf32> to vector<8x1xf32>
    %cst_63 = arith.constant 3.200000e+01 : f32
    %84 = vector.broadcast %cst_63 : f32 to vector<8x1xf32>
    %85 = arith.divf %83, %84 : vector<8x1xf32>
    %86 = vector.broadcast %85 : vector<8x1xf32> to vector<8x32xf32>
    %87 = arith.subf %77, %86 : vector<8x32xf32>
    %88 = arith.mulf %87, %87 : vector<8x32xf32>
    %cst_64 = arith.constant dense<0.000000e+00> : vector<8xf32>
    %89 = vector.multi_reduction <add>, %88, %cst_64 [1] : vector<8x32xf32> to vector<8xf32>
    %90 = vector.shape_cast %89 : vector<8xf32> to vector<8x1xf32>
    %cst_65 = arith.constant 3.100000e+01 : f32
    %91 = vector.broadcast %cst_65 : f32 to vector<8x1xf32>
    %92 = arith.divf %90, %91 : vector<8x1xf32>
    %93 = math.sqrt %92 : vector<8x1xf32>
    %94 = vector.broadcast %85 : vector<8x1xf32> to vector<8x32xf32>
    %95 = arith.subf %77, %94 : vector<8x32xf32>
    %96 = vector.broadcast %79 : vector<1x32xf32> to vector<8x32xf32>
    %97 = arith.mulf %96, %95 : vector<8x32xf32>
    %cst_66 = arith.constant 9.99999997E-7 : f32
    %98 = vector.broadcast %cst_66 : f32 to vector<8x1xf32>
    %99 = arith.addf %93, %98 : vector<8x1xf32>
    %100 = vector.broadcast %99 : vector<8x1xf32> to vector<8x32xf32>
    %101 = arith.divf %97, %100 : vector<8x32xf32>
    %102 = vector.broadcast %81 : vector<1x32xf32> to vector<8x32xf32>
    %103 = arith.addf %101, %102 : vector<8x32xf32>
    %c0_67 = arith.constant 0 : index
    %c0_68 = arith.constant 0 : index
    %c0_69 = arith.constant 0 : index
    %104 = vector.load %arg15[%c0_67, %c0_68, %c0_69] : memref<2x32x64xf32, #tpu.memory_space<vmem>>, vector<1x32x64xf32>
    %105 = vector.shape_cast %104 : vector<1x32x64xf32> to vector<32x64xf32>
    %cst_70 = arith.constant dense<0.000000e+00> : vector<8x64xf32>
    %106 = tpu.matmul %103, %105, %cst_70 {dimension_numbers = #tpu.dot_dimension_numbers<[1], [0], [0], [1], [0, 0, 1, 1], [], []>} : vector<8x32xf32>, vector<32x64xf32>, vector<8x64xf32> -> vector<8x64xf32>
    %c0_71 = arith.constant 0 : index
    %c0_72 = arith.constant 0 : index
    %c0_73 = arith.constant 0 : index
    %107 = vector.load %arg16[%c0_71, %c0_72, %c0_73] : memref<2x1x64xf32, #tpu.memory_space<vmem>>, vector<1x1x64xf32>
    %108 = vector.shape_cast %107 : vector<1x1x64xf32> to vector<1x64xf32>
    %109 = vector.broadcast %108 : vector<1x64xf32> to vector<8x64xf32>
    %110 = arith.addf %106, %109 : vector<8x64xf32>
    %cst_74 = arith.constant 0.000000e+00 : f32
    %111 = vector.broadcast %cst_74 : f32 to vector<8x64xf32>
    %112 = arith.maximumf %110, %111 : vector<8x64xf32>
    %c0_75 = arith.constant 0 : index
    %c0_76 = arith.constant 0 : index
    %c0_77 = arith.constant 0 : index
    %113 = vector.load %arg17[%c0_75, %c0_76, %c0_77] : memref<2x64x32xf32, #tpu.memory_space<vmem>>, vector<1x64x32xf32>
    %114 = vector.shape_cast %113 : vector<1x64x32xf32> to vector<64x32xf32>
    %cst_78 = arith.constant dense<0.000000e+00> : vector<8x32xf32>
    %115 = tpu.matmul %112, %114, %cst_78 {dimension_numbers = #tpu.dot_dimension_numbers<[1], [0], [0], [1], [0, 0, 1, 1], [], []>} : vector<8x64xf32>, vector<64x32xf32>, vector<8x32xf32> -> vector<8x32xf32>
    %c0_79 = arith.constant 0 : index
    %c0_80 = arith.constant 0 : index
    %c0_81 = arith.constant 0 : index
    %116 = vector.load %arg18[%c0_79, %c0_80, %c0_81] : memref<2x1x32xf32, #tpu.memory_space<vmem>>, vector<1x1x32xf32>
    %117 = vector.shape_cast %116 : vector<1x1x32xf32> to vector<1x32xf32>
    %118 = vector.broadcast %117 : vector<1x32xf32> to vector<8x32xf32>
    %119 = arith.addf %115, %118 : vector<8x32xf32>
    %120 = arith.addf %77, %119 : vector<8x32xf32>
    %c1 = arith.constant 1 : index
    %c0_82 = arith.constant 0 : index
    %c0_83 = arith.constant 0 : index
    %121 = vector.load %arg3[%c1, %c0_82, %c0_83] : memref<2x1x32xf32, #tpu.memory_space<vmem>>, vector<1x1x32xf32>
    %122 = vector.shape_cast %121 : vector<1x1x32xf32> to vector<1x32xf32>
    %c1_84 = arith.constant 1 : index
    %c0_85 = arith.constant 0 : index
    %c0_86 = arith.constant 0 : index
    %123 = vector.load %arg4[%c1_84, %c0_85, %c0_86] : memref<2x1x32xf32, #tpu.memory_space<vmem>>, vector<1x1x32xf32>
    %124 = vector.shape_cast %123 : vector<1x1x32xf32> to vector<1x32xf32>
    %cst_87 = arith.constant dense<0.000000e+00> : vector<8xf32>
    %125 = vector.multi_reduction <add>, %120, %cst_87 [1] : vector<8x32xf32> to vector<8xf32>
    %126 = vector.shape_cast %125 : vector<8xf32> to vector<8x1xf32>
    %cst_88 = arith.constant 3.200000e+01 : f32
    %127 = vector.broadcast %cst_88 : f32 to vector<8x1xf32>
    %128 = arith.divf %126, %127 : vector<8x1xf32>
    %129 = vector.broadcast %128 : vector<8x1xf32> to vector<8x32xf32>
    %130 = arith.subf %120, %129 : vector<8x32xf32>
    %131 = arith.mulf %130, %130 : vector<8x32xf32>
    %cst_89 = arith.constant dense<0.000000e+00> : vector<8xf32>
    %132 = vector.multi_reduction <add>, %131, %cst_89 [1] : vector<8x32xf32> to vector<8xf32>
    %133 = vector.shape_cast %132 : vector<8xf32> to vector<8x1xf32>
    %cst_90 = arith.constant 3.100000e+01 : f32
    %134 = vector.broadcast %cst_90 : f32 to vector<8x1xf32>
    %135 = arith.divf %133, %134 : vector<8x1xf32>
    %136 = math.sqrt %135 : vector<8x1xf32>
    %137 = vector.broadcast %128 : vector<8x1xf32> to vector<8x32xf32>
    %138 = arith.subf %120, %137 : vector<8x32xf32>
    %139 = vector.broadcast %122 : vector<1x32xf32> to vector<8x32xf32>
    %140 = arith.mulf %139, %138 : vector<8x32xf32>
    %cst_91 = arith.constant 9.99999997E-7 : f32
    %141 = vector.broadcast %cst_91 : f32 to vector<8x1xf32>
    %142 = arith.addf %136, %141 : vector<8x1xf32>
    %143 = vector.broadcast %142 : vector<8x1xf32> to vector<8x32xf32>
    %144 = arith.divf %140, %143 : vector<8x32xf32>
    %145 = vector.broadcast %124 : vector<1x32xf32> to vector<8x32xf32>
    %146 = arith.addf %144, %145 : vector<8x32xf32>
    %147 = vector.shape_cast %146 : vector<8x32xf32> to vector<1x8x32xf32>
    %148 = vector.broadcast %147 : vector<1x8x32xf32> to vector<4x8x32xf32>
    %c1_92 = arith.constant 1 : index
    %c0_93 = arith.constant 0 : index
    %c0_94 = arith.constant 0 : index
    %c0_95 = arith.constant 0 : index
    %149 = vector.load %arg5[%c1_92, %c0_93, %c0_94, %c0_95] : memref<2x4x32x8xf32, #tpu.memory_space<vmem>>, vector<1x4x32x8xf32>
    %150 = vector.shape_cast %149 : vector<1x4x32x8xf32> to vector<4x32x8xf32>
    "tpu.trace_start"() <{level = 10 : i32, message = "hsd,hdk->hsk"}> : () -> ()
    %cst_96 = arith.constant dense<0.000000e+00> : vector<4x8x8xf32>
    %151 = tpu.matmul %148, %150, %cst_96 {dimension_numbers = #tpu.dot_dimension_numbers<[2], [1], [1], [2], [0, 0, 0, 1, 1, 2], [0], [0]>} : vector<4x8x32xf32>, vector<4x32x8xf32>, vector<4x8x8xf32> -> vector<4x8x8xf32>
    "tpu.trace_stop"() : () -> ()
    %c1_97 = arith.constant 1 : index
    %c0_98 = arith.constant 0 : index
    %c0_99 = arith.constant 0 : index
    %c0_100 = arith.constant 0 : index
    %152 = vector.load %arg8[%c1_97, %c0_98, %c0_99, %c0_100] : memref<2x4x1x8xf32, #tpu.memory_space<vmem>>, vector<1x4x1x8xf32>
    %153 = vector.shape_cast %152 : vector<1x4x1x8xf32> to vector<4x1x8xf32>
    %154 = vector.broadcast %153 : vector<4x1x8xf32> to vector<4x8x8xf32>
    %155 = arith.addf %151, %154 : vector<4x8x8xf32>
    %c1_101 = arith.constant 1 : index
    %c0_102 = arith.constant 0 : index
    %c0_103 = arith.constant 0 : index
    %c0_104 = arith.constant 0 : index
    %156 = vector.load %arg6[%c1_101, %c0_102, %c0_103, %c0_104] : memref<2x4x32x8xf32, #tpu.memory_space<vmem>>, vector<1x4x32x8xf32>
    %157 = vector.shape_cast %156 : vector<1x4x32x8xf32> to vector<4x32x8xf32>
    "tpu.trace_start"() <{level = 10 : i32, message = "hsd,hdk->hsk"}> : () -> ()
    %cst_105 = arith.constant dense<0.000000e+00> : vector<4x8x8xf32>
    %158 = tpu.matmul %148, %157, %cst_105 {dimension_numbers = #tpu.dot_dimension_numbers<[2], [1], [1], [2], [0, 0, 0, 1, 1, 2], [0], [0]>} : vector<4x8x32xf32>, vector<4x32x8xf32>, vector<4x8x8xf32> -> vector<4x8x8xf32>
    "tpu.trace_stop"() : () -> ()
    %c1_106 = arith.constant 1 : index
    %c0_107 = arith.constant 0 : index
    %c0_108 = arith.constant 0 : index
    %c0_109 = arith.constant 0 : index
    %159 = vector.load %arg9[%c1_106, %c0_107, %c0_108, %c0_109] : memref<2x4x1x8xf32, #tpu.memory_space<vmem>>, vector<1x4x1x8xf32>
    %160 = vector.shape_cast %159 : vector<1x4x1x8xf32> to vector<4x1x8xf32>
    %161 = vector.broadcast %160 : vector<4x1x8xf32> to vector<4x8x8xf32>
    %162 = arith.addf %158, %161 : vector<4x8x8xf32>
    %c1_110 = arith.constant 1 : index
    %c0_111 = arith.constant 0 : index
    %c0_112 = arith.constant 0 : index
    %c0_113 = arith.constant 0 : index
    %163 = vector.load %arg7[%c1_110, %c0_111, %c0_112, %c0_113] : memref<2x4x32x8xf32, #tpu.memory_space<vmem>>, vector<1x4x32x8xf32>
    %164 = vector.shape_cast %163 : vector<1x4x32x8xf32> to vector<4x32x8xf32>
    "tpu.trace_start"() <{level = 10 : i32, message = "hsd,hdk->hsk"}> : () -> ()
    %cst_114 = arith.constant dense<0.000000e+00> : vector<4x8x8xf32>
    %165 = tpu.matmul %148, %164, %cst_114 {dimension_numbers = #tpu.dot_dimension_numbers<[2], [1], [1], [2], [0, 0, 0, 1, 1, 2], [0], [0]>} : vector<4x8x32xf32>, vector<4x32x8xf32>, vector<4x8x8xf32> -> vector<4x8x8xf32>
    "tpu.trace_stop"() : () -> ()
    %c1_115 = arith.constant 1 : index
    %c0_116 = arith.constant 0 : index
    %c0_117 = arith.constant 0 : index
    %c0_118 = arith.constant 0 : index
    %166 = vector.load %arg10[%c1_115, %c0_116, %c0_117, %c0_118] : memref<2x4x1x8xf32, #tpu.memory_space<vmem>>, vector<1x4x1x8xf32>
    %167 = vector.shape_cast %166 : vector<1x4x1x8xf32> to vector<4x1x8xf32>
    %168 = vector.broadcast %167 : vector<4x1x8xf32> to vector<4x8x8xf32>
    %169 = arith.addf %165, %168 : vector<4x8x8xf32>
    "tpu.trace_start"() <{level = 10 : i32, message = "hqd,hkd->hqk"}> : () -> ()
    %cst_119 = arith.constant dense<0.000000e+00> : vector<4x8x8xf32>
    %170 = tpu.matmul %155, %162, %cst_119 {dimension_numbers = #tpu.dot_dimension_numbers<[2], [2], [1], [1], [0, 0, 0, 1, 1, 1], [0], [0]>} : vector<4x8x8xf32>, vector<4x8x8xf32>, vector<4x8x8xf32> -> vector<4x8x8xf32>
    "tpu.trace_stop"() : () -> ()
    %cst_120 = arith.constant 0.353553385 : f32
    %171 = vector.broadcast %cst_120 : f32 to vector<4x8x8xf32>
    %172 = arith.mulf %170, %171 : vector<4x8x8xf32>
    %173 = vector.shape_cast %3 : vector<1x8xf32> to vector<1x1x8xf32>
    %174 = vector.broadcast %173 : vector<1x1x8xf32> to vector<4x8x8xf32>
    %175 = arith.addf %172, %174 : vector<4x8x8xf32>
    %cst_121 = arith.constant dense<0xFF800000> : vector<4x8xf32>
    %176 = vector.multi_reduction <maximumf>, %175, %cst_121 [2] : vector<4x8x8xf32> to vector<4x8xf32>
    %177 = vector.shape_cast %176 : vector<4x8xf32> to vector<4x8x1xf32>
    %178 = vector.broadcast %177 : vector<4x8x1xf32> to vector<4x8x8xf32>
    %179 = arith.subf %175, %178 : vector<4x8x8xf32>
    %180 = math.exp %179 : vector<4x8x8xf32>
    %cst_122 = arith.constant dense<0.000000e+00> : vector<4x8xf32>
    %181 = vector.multi_reduction <add>, %180, %cst_122 [2] : vector<4x8x8xf32> to vector<4x8xf32>
    %182 = vector.shape_cast %181 : vector<4x8xf32> to vector<4x8x1xf32>
    %183 = vector.broadcast %182 : vector<4x8x1xf32> to vector<4x8x8xf32>
    %184 = arith.divf %180, %183 : vector<4x8x8xf32>
    "tpu.trace_start"() <{level = 10 : i32, message = "hqk,hkd->hqd"}> : () -> ()
    %cst_123 = arith.constant dense<0.000000e+00> : vector<4x8x8xf32>
    %185 = tpu.matmul %184, %169, %cst_123 {dimension_numbers = #tpu.dot_dimension_numbers<[2], [1], [1], [2], [0, 0, 0, 1, 1, 2], [0], [0]>} : vector<4x8x8xf32>, vector<4x8x8xf32>, vector<4x8x8xf32> -> vector<4x8x8xf32>
    "tpu.trace_stop"() : () -> ()
    %c1_124 = arith.constant 1 : index
    %c0_125 = arith.constant 0 : index
    %c0_126 = arith.constant 0 : index
    %c0_127 = arith.constant 0 : index
    %186 = vector.load %arg11[%c1_124, %c0_125, %c0_126, %c0_127] : memref<2x4x8x32xf32, #tpu.memory_space<vmem>>, vector<1x4x8x32xf32>
    %187 = vector.shape_cast %186 : vector<1x4x8x32xf32> to vector<4x8x32xf32>
    "tpu.trace_start"() <{level = 10 : i32, message = "hqd,hdm->hqm"}> : () -> ()
    %cst_128 = arith.constant dense<0.000000e+00> : vector<4x8x32xf32>
    %188 = tpu.matmul %185, %187, %cst_128 {dimension_numbers = #tpu.dot_dimension_numbers<[2], [1], [1], [2], [0, 0, 0, 1, 1, 2], [0], [0]>} : vector<4x8x8xf32>, vector<4x8x32xf32>, vector<4x8x32xf32> -> vector<4x8x32xf32>
    "tpu.trace_stop"() : () -> ()
    %cst_129 = arith.constant dense<0.000000e+00> : vector<8x32xf32>
    %189 = vector.multi_reduction <add>, %188, %cst_129 [0] : vector<4x8x32xf32> to vector<8x32xf32>
    %190 = arith.addf %120, %189 : vector<8x32xf32>
    %c1_130 = arith.constant 1 : index
    %c0_131 = arith.constant 0 : index
    %c0_132 = arith.constant 0 : index
    %191 = vector.load %arg12[%c1_130, %c0_131, %c0_132] : memref<2x1x32xf32, #tpu.memory_space<vmem>>, vector<1x1x32xf32>
    %192 = vector.shape_cast %191 : vector<1x1x32xf32> to vector<1x32xf32>
    %193 = vector.broadcast %192 : vector<1x32xf32> to vector<8x32xf32>
    %194 = arith.addf %190, %193 : vector<8x32xf32>
    %c1_133 = arith.constant 1 : index
    %c0_134 = arith.constant 0 : index
    %c0_135 = arith.constant 0 : index
    %195 = vector.load %arg13[%c1_133, %c0_134, %c0_135] : memref<2x1x32xf32, #tpu.memory_space<vmem>>, vector<1x1x32xf32>
    %196 = vector.shape_cast %195 : vector<1x1x32xf32> to vector<1x32xf32>
    %c1_136 = arith.constant 1 : index
    %c0_137 = arith.constant 0 : index
    %c0_138 = arith.constant 0 : index
    %197 = vector.load %arg14[%c1_136, %c0_137, %c0_138] : memref<2x1x32xf32, #tpu.memory_space<vmem>>, vector<1x1x32xf32>
    %198 = vector.shape_cast %197 : vector<1x1x32xf32> to vector<1x32xf32>
    %cst_139 = arith.constant dense<0.000000e+00> : vector<8xf32>
    %199 = vector.multi_reduction <add>, %194, %cst_139 [1] : vector<8x32xf32> to vector<8xf32>
    %200 = vector.shape_cast %199 : vector<8xf32> to vector<8x1xf32>
    %cst_140 = arith.constant 3.200000e+01 : f32
    %201 = vector.broadcast %cst_140 : f32 to vector<8x1xf32>
    %202 = arith.divf %200, %201 : vector<8x1xf32>
    %203 = vector.broadcast %202 : vector<8x1xf32> to vector<8x32xf32>
    %204 = arith.subf %194, %203 : vector<8x32xf32>
    %205 = arith.mulf %204, %204 : vector<8x32xf32>
    %cst_141 = arith.constant dense<0.000000e+00> : vector<8xf32>
    %206 = vector.multi_reduction <add>, %205, %cst_141 [1] : vector<8x32xf32> to vector<8xf32>
    %207 = vector.shape_cast %206 : vector<8xf32> to vector<8x1xf32>
    %cst_142 = arith.constant 3.100000e+01 : f32
    %208 = vector.broadcast %cst_142 : f32 to vector<8x1xf32>
    %209 = arith.divf %207, %208 : vector<8x1xf32>
    %210 = math.sqrt %209 : vector<8x1xf32>
    %211 = vector.broadcast %202 : vector<8x1xf32> to vector<8x32xf32>
    %212 = arith.subf %194, %211 : vector<8x32xf32>
    %213 = vector.broadcast %196 : vector<1x32xf32> to vector<8x32xf32>
    %214 = arith.mulf %213, %212 : vector<8x32xf32>
    %cst_143 = arith.constant 9.99999997E-7 : f32
    %215 = vector.broadcast %cst_143 : f32 to vector<8x1xf32>
    %216 = arith.addf %210, %215 : vector<8x1xf32>
    %217 = vector.broadcast %216 : vector<8x1xf32> to vector<8x32xf32>
    %218 = arith.divf %214, %217 : vector<8x32xf32>
    %219 = vector.broadcast %198 : vector<1x32xf32> to vector<8x32xf32>
    %220 = arith.addf %218, %219 : vector<8x32xf32>
    %c1_144 = arith.constant 1 : index
    %c0_145 = arith.constant 0 : index
    %c0_146 = arith.constant 0 : index
    %221 = vector.load %arg15[%c1_144, %c0_145, %c0_146] : memref<2x32x64xf32, #tpu.memory_space<vmem>>, vector<1x32x64xf32>
    %222 = vector.shape_cast %221 : vector<1x32x64xf32> to vector<32x64xf32>
    %cst_147 = arith.constant dense<0.000000e+00> : vector<8x64xf32>
    %223 = tpu.matmul %220, %222, %cst_147 {dimension_numbers = #tpu.dot_dimension_numbers<[1], [0], [0], [1], [0, 0, 1, 1], [], []>} : vector<8x32xf32>, vector<32x64xf32>, vector<8x64xf32> -> vector<8x64xf32>
    %c1_148 = arith.constant 1 : index
    %c0_149 = arith.constant 0 : index
    %c0_150 = arith.constant 0 : index
    %224 = vector.load %arg16[%c1_148, %c0_149, %c0_150] : memref<2x1x64xf32, #tpu.memory_space<vmem>>, vector<1x1x64xf32>
    %225 = vector.shape_cast %224 : vector<1x1x64xf32> to vector<1x64xf32>
    %226 = vector.broadcast %225 : vector<1x64xf32> to vector<8x64xf32>
    %227 = arith.addf %223, %226 : vector<8x64xf32>
    %cst_151 = arith.constant 0.000000e+00 : f32
    %228 = vector.broadcast %cst_151 : f32 to vector<8x64xf32>
    %229 = arith.maximumf %227, %228 : vector<8x64xf32>
    %c1_152 = arith.constant 1 : index
    %c0_153 = arith.constant 0 : index
    %c0_154 = arith.constant 0 : index
    %230 = vector.load %arg17[%c1_152, %c0_153, %c0_154] : memref<2x64x32xf32, #tpu.memory_space<vmem>>, vector<1x64x32xf32>
    %231 = vector.shape_cast %230 : vector<1x64x32xf32> to vector<64x32xf32>
    %cst_155 = arith.constant dense<0.000000e+00> : vector<8x32xf32>
    %232 = tpu.matmul %229, %231, %cst_155 {dimension_numbers = #tpu.dot_dimension_numbers<[1], [0], [0], [1], [0, 0, 1, 1], [], []>} : vector<8x64xf32>, vector<64x32xf32>, vector<8x32xf32> -> vector<8x32xf32>
    %c1_156 = arith.constant 1 : index
    %c0_157 = arith.constant 0 : index
    %c0_158 = arith.constant 0 : index
    %233 = vector.load %arg18[%c1_156, %c0_157, %c0_158] : memref<2x1x32xf32, #tpu.memory_space<vmem>>, vector<1x1x32xf32>
    %234 = vector.shape_cast %233 : vector<1x1x32xf32> to vector<1x32xf32>
    %235 = vector.broadcast %234 : vector<1x32xf32> to vector<8x32xf32>
    %236 = arith.addf %232, %235 : vector<8x32xf32>
    %237 = arith.addf %194, %236 : vector<8x32xf32>
    %c0_159 = arith.constant 0 : index
    %c0_160 = arith.constant 0 : index
    %238 = vector.load %arg19[%c0_159, %c0_160] : memref<1x32xf32, #tpu.memory_space<vmem>>, vector<1x32xf32>
    %c0_161 = arith.constant 0 : index
    %c0_162 = arith.constant 0 : index
    %239 = vector.load %arg20[%c0_161, %c0_162] : memref<1x32xf32, #tpu.memory_space<vmem>>, vector<1x32xf32>
    %cst_163 = arith.constant dense<0.000000e+00> : vector<8xf32>
    %240 = vector.multi_reduction <add>, %237, %cst_163 [1] : vector<8x32xf32> to vector<8xf32>
    %241 = vector.shape_cast %240 : vector<8xf32> to vector<8x1xf32>
    %cst_164 = arith.constant 3.200000e+01 : f32
    %242 = vector.broadcast %cst_164 : f32 to vector<8x1xf32>
    %243 = arith.divf %241, %242 : vector<8x1xf32>
    %244 = vector.broadcast %243 : vector<8x1xf32> to vector<8x32xf32>
    %245 = arith.subf %237, %244 : vector<8x32xf32>
    %246 = arith.mulf %245, %245 : vector<8x32xf32>
    %cst_165 = arith.constant dense<0.000000e+00> : vector<8xf32>
    %247 = vector.multi_reduction <add>, %246, %cst_165 [1] : vector<8x32xf32> to vector<8xf32>
    %248 = vector.shape_cast %247 : vector<8xf32> to vector<8x1xf32>
    %cst_166 = arith.constant 3.100000e+01 : f32
    %249 = vector.broadcast %cst_166 : f32 to vector<8x1xf32>
    %250 = arith.divf %248, %249 : vector<8x1xf32>
    %251 = math.sqrt %250 : vector<8x1xf32>
    %252 = vector.broadcast %243 : vector<8x1xf32> to vector<8x32xf32>
    %253 = arith.subf %237, %252 : vector<8x32xf32>
    %254 = vector.broadcast %238 : vector<1x32xf32> to vector<8x32xf32>
    %255 = arith.mulf %254, %253 : vector<8x32xf32>
    %cst_167 = arith.constant 9.99999997E-7 : f32
    %256 = vector.broadcast %cst_167 : f32 to vector<8x1xf32>
    %257 = arith.addf %251, %256 : vector<8x1xf32>
    %258 = vector.broadcast %257 : vector<8x1xf32> to vector<8x32xf32>
    %259 = arith.divf %255, %258 : vector<8x32xf32>
    %260 = vector.broadcast %239 : vector<1x32xf32> to vector<8x32xf32>
    %261 = arith.addf %259, %260 : vector<8x32xf32>
    %c0_168 = arith.constant 0 : index
    %c0_169 = arith.constant 0 : index
    %c0_170 = arith.constant 0 : index
    %262 = vector.load %arg21[%c0_168, %c0_169, %c0_170] : memref<1x8x32xf32, #tpu.memory_space<vmem>>, vector<1x8x32xf32>
    %263 = vector.shape_cast %262 : vector<1x8x32xf32> to vector<8x32xf32>
    %264 = vector.shape_cast %261 : vector<8x32xf32> to vector<1x8x32xf32>
    tpu.vector_store %arg21[%c0_168, %c0_169, %c0_170], %264 {strides = array<i32>} : memref<1x8x32xf32, #tpu.memory_space<vmem>>, vector<1x8x32xf32>,
    return
  }
  func.func @transform_0(%arg0: i32) -> (i32, i32, i32) {
    %c0_i32 = arith.constant 0 : i32
    %c0_i32_0 = arith.constant 0 : i32
    %c0_i32_1 = arith.constant 0 : i32
    return %arg0, %c0_i32, %c0_i32_0 : i32, i32, i32
  }
  func.func @transform_1(%arg0: i32) -> (i32, i32, i32) {
    %c0_i32 = arith.constant 0 : i32
    %c0_i32_0 = arith.constant 0 : i32
    %c0_i32_1 = arith.constant 0 : i32
    return %arg0, %c0_i32, %c0_i32_0 : i32, i32, i32
  }
  func.func @transform_2(%arg0: i32) -> (i32, i32, i32) {
    %c0_i32 = arith.constant 0 : i32
    %c0_i32_0 = arith.constant 0 : i32
    %c0_i32_1 = arith.constant 0 : i32
    %c0_i32_2 = arith.constant 0 : i32
    return %c0_i32, %c0_i32_0, %c0_i32_1 : i32, i32, i32
  }
  func.func @transform_3(%arg0: i32) -> (i32, i32, i32) {
    %c0_i32 = arith.constant 0 : i32
    %c0_i32_0 = arith.constant 0 : i32
    %c0_i32_1 = arith.constant 0 : i32
    %c0_i32_2 = arith.constant 0 : i32
    return %c0_i32, %c0_i32_0, %c0_i32_1 : i32, i32, i32
  }
  func.func @transform_4(%arg0: i32) -> (i32, i32, i32, i32) {
    %c0_i32 = arith.constant 0 : i32
    %c0_i32_0 = arith.constant 0 : i32
    %c0_i32_1 = arith.constant 0 : i32
    %c0_i32_2 = arith.constant 0 : i32
    %c0_i32_3 = arith.constant 0 : i32
    return %c0_i32, %c0_i32_0, %c0_i32_1, %c0_i32_2 : i32, i32, i32, i32
  }
  func.func @transform_5(%arg0: i32) -> (i32, i32, i32, i32) {
    %c0_i32 = arith.constant 0 : i32
    %c0_i32_0 = arith.constant 0 : i32
    %c0_i32_1 = arith.constant 0 : i32
    %c0_i32_2 = arith.constant 0 : i32
    %c0_i32_3 = arith.constant 0 : i32
    return %c0_i32, %c0_i32_0, %c0_i32_1, %c0_i32_2 : i32, i32, i32, i32
  }
  func.func @transform_6(%arg0: i32) -> (i32, i32, i32, i32) {
    %c0_i32 = arith.constant 0 : i32
    %c0_i32_0 = arith.constant 0 : i32
    %c0_i32_1 = arith.constant 0 : i32
    %c0_i32_2 = arith.constant 0 : i32
    %c0_i32_3 = arith.constant 0 : i32
    return %c0_i32, %c0_i32_0, %c0_i32_1, %c0_i32_2 : i32, i32, i32, i32
  }
  func.func @transform_7(%arg0: i32) -> (i32, i32, i32, i32) {
    %c0_i32 = arith.constant 0 : i32
    %c0_i32_0 = arith.constant 0 : i32
    %c0_i32_1 = arith.constant 0 : i32
    %c0_i32_2 = arith.constant 0 : i32
    %c0_i32_3 = arith.constant 0 : i32
    return %c0_i32, %c0_i32_0, %c0_i32_1, %c0_i32_2 : i32, i32, i32, i32
  }
  func.func @transform_8(%arg0: i32) -> (i32, i32, i32, i32) {
    %c0_i32 = arith.constant 0 : i32
    %c0_i32_0 = arith.constant 0 : i32
    %c0_i32_1 = arith.constant 0 : i32
    %c0_i32_2 = arith.constant 0 : i32
    %c0_i32_3 = arith.constant 0 : i32
    return %c0_i32, %c0_i32_0, %c0_i32_1, %c0_i32_2 : i32, i32, i32, i32
  }
  func.func @transform_9(%arg0: i32) -> (i32, i32, i32, i32) {
    %c0_i32 = arith.constant 0 : i32
    %c0_i32_0 = arith.constant 0 : i32
    %c0_i32_1 = arith.constant 0 : i32
    %c0_i32_2 = arith.constant 0 : i32
    %c0_i32_3 = arith.constant 0 : i32
    return %c0_i32, %c0_i32_0, %c0_i32_1, %c0_i32_2 : i32, i32, i32, i32
  }
  func.func @transform_10(%arg0: i32) -> (i32, i32, i32, i32) {
    %c0_i32 = arith.constant 0 : i32
    %c0_i32_0 = arith.constant 0 : i32
    %c0_i32_1 = arith.constant 0 : i32
    %c0_i32_2 = arith.constant 0 : i32
    %c0_i32_3 = arith.constant 0 : i32
    return %c0_i32, %c0_i32_0, %c0_i32_1, %c0_i32_2 : i32, i32, i32, i32
  }
  func.func @transform_11(%arg0: i32) -> (i32, i32, i32) {
    %c0_i32 = arith.constant 0 : i32
    %c0_i32_0 = arith.constant 0 : i32
    %c0_i32_1 = arith.constant 0 : i32
    %c0_i32_2 = arith.constant 0 : i32
    return %c0_i32, %c0_i32_0, %c0_i32_1 : i32, i32, i32
  }
  func.func @transform_12(%arg0: i32) -> (i32, i32, i32) {
    %c0_i32 = arith.constant 0 : i32
    %c0_i32_0 = arith.constant 0 : i32
    %c0_i32_1 = arith.constant 0 : i32
    %c0_i32_2 = arith.constant 0 : i32
    return %c0_i32, %c0_i32_0, %c0_i32_1 : i32, i32, i32
  }
  func.func @transform_13(%arg0: i32) -> (i32, i32, i32) {
    %c0_i32 = arith.constant 0 : i32
    %c0_i32_0 = arith.constant 0 : i32
    %c0_i32_1 = arith.constant 0 : i32
    %c0_i32_2 = arith.constant 0 : i32
    return %c0_i32, %c0_i32_0, %c0_i32_1 : i32, i32, i32
  }
  func.func @transform_14(%arg0: i32) -> (i32, i32, i32) {
    %c0_i32 = arith.constant 0 : i32
    %c0_i32_0 = arith.constant 0 : i32
    %c0_i32_1 = arith.constant 0 : i32
    %c0_i32_2 = arith.constant 0 : i32
    return %c0_i32, %c0_i32_0, %c0_i32_1 : i32, i32, i32
  }
  func.func @transform_15(%arg0: i32) -> (i32, i32, i32) {
    %c0_i32 = arith.constant 0 : i32
    %c0_i32_0 = arith.constant 0 : i32
    %c0_i32_1 = arith.constant 0 : i32
    %c0_i32_2 = arith.constant 0 : i32
    return %c0_i32, %c0_i32_0, %c0_i32_1 : i32, i32, i32
  }
  func.func @transform_16(%arg0: i32) -> (i32, i32, i32) {
    %c0_i32 = arith.constant 0 : i32
    %c0_i32_0 = arith.constant 0 : i32
    %c0_i32_1 = arith.constant 0 : i32
    %c0_i32_2 = arith.constant 0 : i32
    return %c0_i32, %c0_i32_0, %c0_i32_1 : i32, i32, i32
  }
  func.func @transform_17(%arg0: i32) -> (i32, i32, i32) {
    %c0_i32 = arith.constant 0 : i32
    %c0_i32_0 = arith.constant 0 : i32
    %c0_i32_1 = arith.constant 0 : i32
    %c0_i32_2 = arith.constant 0 : i32
    return %c0_i32, %c0_i32_0, %c0_i32_1 : i32, i32, i32
  }
  func.func @transform_18(%arg0: i32) -> (i32, i32) {
    %c0_i32 = arith.constant 0 : i32
    %c0_i32_0 = arith.constant 0 : i32
    %c0_i32_1 = arith.constant 0 : i32
    return %c0_i32, %c0_i32_0 : i32, i32
  }
  func.func @transform_19(%arg0: i32) -> (i32, i32) {
    %c0_i32 = arith.constant 0 : i32
    %c0_i32_0 = arith.constant 0 : i32
    %c0_i32_1 = arith.constant 0 : i32
    return %c0_i32, %c0_i32_0 : i32, i32
  }
  func.func @transform_20(%arg0: i32) -> (i32, i32, i32) {
    %c0_i32 = arith.constant 0 : i32
    %c0_i32_0 = arith.constant 0 : i32
    %c0_i32_1 = arith.constant 0 : i32
    return %arg0, %c0_i32, %c0_i32_0 : i32, i32, i32
  }
}

</mosaic_0001>

<bundles_post_ra>
// kernel: encoder_forward.1
= control target key start
LH: loop header
LB: loop body
LE: loop exit
PB: predicated region body
PF: predicated region fallthrough
CT: control target
= control target key end

     0   :  { %s7257_s0 = inlined_call_operand.vmem [shape: f32[2,8,32], index: 0, kind: input, shape index: {}]   ;;  %s7258_s1 = inlined_call_operand.vmem [shape: f32[2,1,8], index: 1, kind: input, shape index: {}]   ;;  %s7259_s2 = inlined_call_operand.vmem [shape: f32[2,1,32], index: 2, kind: input, shape index: {}]   ;;  %s7260_s3 = inlined_call_operand.vmem [shape: f32[2,1,32], index: 3, kind: input, shape index: {}]   ;;  %s7261_s4 = inlined_call_operand.vmem [shape: f32[2,4,32,8], index: 4, kind: input, shape index: {}]   ;;  %s7262_s5 = inlined_call_operand.vmem [shape: f32[2,4,32,8], index: 5, kind: input, shape index: {}]   ;;  %s7263_s6 = inlined_call_operand.vmem [shape: f32[2,4,32,8], index: 6, kind: input, shape index: {}]   ;;  %s7264_s7 = inlined_call_operand.vmem [shape: f32[2,4,1,8], index: 7, kind: input, shape index: {}]   ;;  %s7265_s8 = inlined_call_operand.vmem [shape: f32[2,4,1,8], index: 8, kind: input, shape index: {}]   ;;  %s7266_s9 = inlined_call_operand.vmem [shape: f32[2,4,1,8], index: 9, kind: input, shape index: {}]   ;;  %s7267_s10 = inlined_call_operand.vmem [shape: f32[2,4,8,32], index: 10, kind: input, shape index: {}]   ;;  %s7268_s11 = inlined_call_operand.vmem [shape: f32[2,1,32], index: 11, kind: input, shape index: {}]   ;;  %s7269_s12 = inlined_call_operand.vmem [shape: f32[2,1,32], index: 12, kind: input, shape index: {}]   ;;  %s7270_s13 = inlined_call_operand.vmem [shape: f32[2,1,32], index: 13, kind: input, shape index: {}]   ;;  %s7271_s14 = inlined_call_operand.vmem [shape: f32[2,32,64], index: 14, kind: input, shape index: {}]   ;;  %s7272_s15 = inlined_call_operand.vmem [shape: f32[2,1,64], index: 15, kind: input, shape index: {}]   ;;  %s7273_s16 = inlined_call_operand.vmem [shape: f32[2,64,32], index: 16, kind: input, shape index: {}]   ;;  %s7274_s17 = inlined_call_operand.vmem [shape: f32[2,1,32], index: 17, kind: input, shape index: {}]   ;;  %s7275_s18 = inlined_call_operand.vmem [shape: f32[1,32], index: 18, kind: input, shape index: {}]   ;;  %s7276_s19 = inlined_call_operand.vmem [shape: f32[1,32], index: 19, kind: input, shape index: {}]   ;;  %s7277_s20 = inlined_call_operand.hbm [shape: f32[2,8,32], index: 20, kind: output, shape index: {}]  }
   0x1   :  { %7288 = sst [smem:[#allocation11_spill]] %s7257_s0 }
   0x2   :  { %7289 = sst [smem:[#allocation12_spill]] %s7258_s1 }
   0x3   :  { %7290 = sst [smem:[#allocation13_spill]] %s7259_s2 }
   0x4   :  { %7291 = sst [smem:[#allocation14_spill]] %s7260_s3 }
   0x5   :  { %7292 = sst [smem:[#allocation15_spill]] %s7261_s4 }
   0x6   :  { %7293 = sst [smem:[#allocation16_spill]] %s7262_s5 }
   0x7   :  { %7294 = sst [smem:[#allocation17_spill]] %s7263_s6 }
   0x8   :  { %25 = vsyncpa [#allocation3], 0 }
   0x9   :  { %27 = vsyncpa [#allocation3 + $0x1], 0  ;;  %s6246_s1 = smov 0   ;;  %s6248_s22 = smov 0  }
   0xa   :  { %s6250_s23 = smov 0   ;;  %s6252_s24 = smov 0  }
   0xb LB: > { %7295 = sst [smem:[#allocation5_spill]] %s6124_s1  ;;  %s6267_s2 = sadd.s32 4294967295, %s6136_s24   ;;  %s6136_s24 = sphi %s6252_s24, %s7313_s24   ;;  %s6132_s23 = sphi %s6250_s23, %s7315_s23   ;;  %s6128_s22 = sphi %s6248_s22, %s7317_s22   ;;  %s6124_s1 = sphi %s6246_s1, %s7316_s1  }
   0xc   : > { %7296 = sst [smem:[#allocation6_spill]] %s6132_s23  ;;  %s5149_s25 = sadd.s32 4294967294, %s6136_s24  }
   0xd   : > { %7297 = sst [smem:[#allocation7_spill]] %s6136_s24  ;;  %s6271_s3 = sadd.s32 1, %s6136_s24  }
   0xe   : > { %7298 = sst [smem:[#allocation8_spill]] %s6271_s3  ;;  %s470_s26 = sadd.s32 1, %s6132_s23 }
   0xf   : > { %s467_s27 = ssub.s32 %s6136_s24, %s6271_s3  ;;  %p480_p0 = scmp.ne.s32.totalorder %s6132_s23, %s6128_s22 }
  0x10   : > { %p468_p1 = scmp.eq.s32.totalorder %s467_s27, 0  ;;  %p481_p2 = scmp.eq.s32.totalorder %s6267_s2, 1 }
  0x11   : > { %p486_p3 = scmp.ne.s32.totalorder %s6128_s22, %s6124_s1  ;;  %p487_p4 = scmp.eq.s32.totalorder %s5149_s25, 1 }
  0x12   : > { %s6282_s28 = scalar_select %p468_p1, %s6132_s23, %s470_s26  }
  0x13   : > { %p6284_p5 = por %p481_p2, %p480_p0  ;;  %p6288_p6 = por %p487_p4, %p486_p3 }
  0x14   : > { %7299 = sst [smem:[#allocation9_spill]] %s6282_s28  ;;  %p5152_p7 = scmp.ge.s32.totalorder %s6136_s24, 1 }
  0x15   : > { %s7301_s29 = scalar_select %p6288_p6, 1, 0 }
  0x16   : > { %p572_p8 = scmp.lt.s32.totalorder %s6136_s24, 3 }
  0x17   : > { %7302 = sst [smem:[#allocation10_spill]] %s7301_s29 }
  0x18   : > { %p573_p9 = pnand %p5152_p7, %p572_p8 }
  0x19   : > { %p632_p10 = scmp.lt.s32.totalorder (!%p573_p9), %s6267_s2, 1  ;;  %s7303_s26 = sld [smem:[#allocation11_spill]] (!%p573_p9) }
  0x1a   : > { %576 = sbr.rel (%p573_p9) target bundleno = 4728 (0x1278), region = 100  ;;  %s7304_s25 = sld [smem:[#allocation15_spill]] (!%p573_p9) }
  0x1b   : > { %s7306_s3 = sld [smem:[#allocation14_spill]] (!%p573_p9)  ;;  %s5340_s24 = sshll.u32 (!%p573_p9), %s6267_s2, 7 }
  0x1c   : > { %s7307_s5 = sld [smem:[#allocation16_spill]] (!%p573_p9) }
  0x1d   : > { %s7308_s6 = sld [smem:[#allocation17_spill]] (!%p573_p9) }
  0x1f   : > { %s6296_s30 = scalar_select %p632_p10, %s6267_s2, 1  ;;  %vm643_vm0 = vcmask 261120   ;;  %v6138_v7 = vmov 0.0   ;;  %vm6139_vm1 = vmmov 0   ;;  %vm1655_vm4 = vcmask 64512  }
  0x20   : > { %5539 = vmatprep.subr.mxu0 %v6138_v7  ;;  %5550 = vmatprep.subr.mxu1 %v6138_v7  ;;  %v683_v8 = vld [vmem:[%s7304_s25 + $0x18] sm:$0xff]  ;;  %v682_v10 = vld [vmem:[%s7304_s25 + $0x10] sm:$0xff]  ;;  %v681_v12 = vld [vmem:[%s7304_s25 + $0x8] sm:$0xff]  ;;  %vm2758_vm7 = vcmask 523264  }
  0x21   : > { %s5154_s0 = sshll.u32 %s6296_s30, 3  ;;  %v687_v9 = vld [vmem:[%s7304_s25 + $0x38] sm:$0xff]  ;;  %5540 = vmatpush3.msra.mxu0 %v683_v8  ;;  %v686_v11 = vld [vmem:[%s7304_s25 + $0x30] sm:$0xff]  ;;  %v685_v13 = vld [vmem:[%s7304_s25 + $0x28] sm:$0xff]  ;;  %5547 = vmatprep.mubr.msk.f32.mxu0 %vm6139_vm1, %v6138_v7 }
  0x22   : > { %s635_s27 = scalar_lea.vmem %s7303_s26, %s5154_s0  ;;  %5551 = vmatpush3.msra.mxu1 %v687_v9  ;;  %5541 = vmatprep.subr.mxu0 %v6138_v7  ;;  %v680_v14 = vld [vmem:[%s7304_s25] sm:$0xff]  ;;  %s7305_s26 = sld [smem:[#allocation13_spill]]  ;;  %v691_v30 = vld [vmem:[%s7304_s25 + $0x58] sm:$0xff]  ;;  %v690_v32 = vld [vmem:[%s7304_s25 + $0x50] sm:$0xff] }
  0x23   : > { %v6302_v0 = vld [vmem:[%s635_s27] sm:$0xff]  ;;  %5552 = vmatprep.subr.mxu1 %v6138_v7  ;;  %5542 = vmatpush3.msra.mxu0 %v682_v10  ;;  %v695_v31 = vld [vmem:[%s7304_s25 + $0x78] sm:$0xff]  ;;  %v694_v33 = vld [vmem:[%s7304_s25 + $0x70] sm:$0xff]  ;;  %s7309_s27 = sld [smem:[#allocation12_spill]]  ;;  %s629_s0 = sand.u32 1, %s6128_s22  }
  0x24   : > { %v644_v1 = vsel %vm643_vm0, %v6302_v0, 0.0  ;;  %5553 = vmatpush3.msra.mxu1 %v686_v11  ;;  %5543 = vmatprep.subr.mxu0 %v6138_v7  ;;  %v684_v15 = vld [vmem:[%s7304_s25 + $0x20] sm:$0xff]  ;;  %v689_v34 = vld [vmem:[%s7304_s25 + $0x48] sm:$0xff]  ;;  %v1010_v38 = vld [vmem:[%s7307_s5 + $0x18] sm:$0xff]  ;;  %s5153_s21 = sshll.u32 %s629_s0, 3 }
  0x25   : > { %645 = vadd.xlane.f32.xlu0 %v644_v1  ;;  %5554 = vmatprep.subr.mxu1 %v6138_v7  ;;  %v5156_v27 = vld [vmem:[%s7306_s3] ss:$0 sm:$0xff]  ;;  %v693_v35 = vld [vmem:[%s7304_s25 + $0x68] sm:$0xff]  ;;  %v1014_v39 = vld [vmem:[%s7307_s5 + $0x38] sm:$0xff]  ;;  %s631_s28 = scalar_lea.vmem [#allocation2], %s5153_s21 }
  0x26   : > { %5544 = vmatpush3.msra.mxu0 %v681_v12  ;;  %5555 = vmatpush3.msra.mxu1 %v685_v13  ;;  %v688_v36 = vld [vmem:[%s7304_s25 + $0x40] sm:$0xff]  ;;  %v1009_v40 = vld [vmem:[%s7307_s5 + $0x10] sm:$0xff]  ;;  %v1008_v42 = vld [vmem:[%s7307_s5 + $0x8] sm:$0xff]  ;;  %s5081_s29 = sshll.u32 %s631_s28, 4  ;;  %s5082_s29 = int_to_ptr.vmem [resolvable:$true] %s5081_s29 }
  0x27   : > { %5545 = vmatprep.subr.mxu0 %v6138_v7  ;;  %5556 = vmatprep.subr.mxu1 %v6138_v7  ;;  %v692_v37 = vld [vmem:[%s7304_s25 + $0x60] sm:$0xff]  ;;  %v1013_v41 = vld [vmem:[%s7307_s5 + $0x30] sm:$0xff]  ;;  %v1012_v43 = vld [vmem:[%s7307_s5 + $0x28] sm:$0xff] }
  0x28   : > { %5546 = vmatpush3.msra.mxu0 %v680_v14  ;;  %5557 = vmatpush3.msra.mxu1 %v684_v15  ;;  %v5155_v24 = vld [vmem:[%s7305_s26] ss:$0 sm:$0xff]  ;;  %v1018_v46 = vld [vmem:[%s7307_s5 + $0x58] sm:$0xff]  ;;  %v1017_v48 = vld [vmem:[%s7307_s5 + $0x50] sm:$0xff] }
  0x29   : > { %5558 = vmatprep.mubr.msk.f32.mxu1 %vm6139_vm1, %v6138_v7  ;;  %5561 = vmatprep.subr.mxu0 %v6138_v7  ;;  %v1007_v44 = vld [vmem:[%s7307_s5] sm:$0xff]  ;;  %v1022_v47 = vld [vmem:[%s7307_s5 + $0x78] sm:$0xff]  ;;  %v1021_v49 = vld [vmem:[%s7307_s5 + $0x70] sm:$0xff]  ;;  %s638_s23 = scalar_lea.vmem %s7309_s27, %s6296_s30  ;;  %s5068_s27 = scalar_lea.sflag [#allocation3], %s629_s0 }
  0x2a   : > { %5572 = vmatprep.subr.mxu1 %v6138_v7  ;;  %v1011_v45 = vld [vmem:[%s7307_s5 + $0x20] sm:$0xff]  ;;  %v1016_v50 = vld [vmem:[%s7307_s5 + $0x48] sm:$0xff]  ;;  %v1334_v54 = vld [vmem:[%s7308_s6 + $0x18] sm:$0xff]  ;;  %s6140_s30 = smov [#allocation2]  }
  0x2b   : > { %v1020_v51 = vld [vmem:[%s7307_s5 + $0x68] sm:$0xff]  ;;  %v1015_v52 = vld [vmem:[%s7307_s5 + $0x40] sm:$0xff]  ;;  %v1338_v55 = vld [vmem:[%s7308_s6 + $0x38] sm:$0xff]  ;;  %s6080_s1 = sshll.u32 %s6140_s30, 4  ;;  %s6081_s1 = int_to_ptr.vmem [resolvable:$false] %s6080_s1 }
  0x2c   : > { %v1019_v53 = vld [vmem:[%s7307_s5 + $0x60] sm:$0xff]  ;;  %v1333_v56 = vld [vmem:[%s7308_s6 + $0x10] sm:$0xff]  ;;  %v1332_v58 = vld [vmem:[%s7308_s6 + $0x8] sm:$0xff]  ;;  %s6082_s2 = scalar_lea.vmem %s6081_s1, 256  ;;  %p6083_p0 = scmp.lt.s32.totalorder %s5082_s29, %s6081_s1 }
  0x2d   : > { %v1337_v57 = vld [vmem:[%s7308_s6 + $0x30] sm:$0xff]  ;;  %v1336_v59 = vld [vmem:[%s7308_s6 + $0x28] sm:$0xff]  ;;  %v1331_v60 = vld [vmem:[%s7308_s6] sm:$0xff] }
  0x2e   : > { %v1335_v61 = vld [vmem:[%s7308_s6 + $0x20] sm:$0xff]  ;;  %v1342_v62 = vld [vmem:[%s7308_s6 + $0x58] sm:$0xff]  ;;  %v1341_v1 = vld [vmem:[%s7308_s6 + $0x50] sm:$0xff] }
  0x2f   : > { %v1346_v63 = vld [vmem:[%s7308_s6 + $0x78] sm:$0xff] }
  0xae   : > { %v646_v2 = vpop.xlane.xlu0 %645 }
  0xaf   : > { %v648_v3 = vmul.f32 0.03125, %v646_v2  ;;  %v1345_v2 = vld [vmem:[%s7308_s6 + $0x70] sm:$0xff] }
  0xb1   : > { %v649_v4 = vsub.f32 %v6302_v0, %v648_v3  ;;  %v1340_v3 = vld [vmem:[%s7308_s6 + $0x48] sm:$0xff] }
  0xb3   : > { %v650_v5 = vmul.f32 %v649_v4, %v649_v4  ;;  %v669_v25 = vmul.f32 %v5155_v24, %v649_v4  ;;  %v1344_v4 = vld [vmem:[%s7308_s6 + $0x68] sm:$0xff] }
  0xb5   : > { %v651_v6 = vsel %vm643_vm0, %v650_v5, 0.0  ;;  %v1339_v5 = vld [vmem:[%s7308_s6 + $0x40] sm:$0xff] }
  0xb6   : > { %652 = vadd.xlane.f32.xlu0 %v651_v6  ;;  %v1343_v6 = vld [vmem:[%s7308_s6 + $0x60] sm:$0xff] }
 0x13f   : > { %v653_v16 = vpop.xlane.xlu0 %652 }
 0x140   : > { %v655_v17 = vmul.f32 0.032258064, %v653_v16  ;;  %v5165_v16 = vld [vmem:[%s7265_s8] ss:$0 sm:$0xff] }
 0x142   : > { %6024 = vrsqrt.f32 %v655_v17  ;;  %vm658_vm2 = vcmp.eq.f32.partialorder %v655_v17, inf  ;;  %v661_v20 = vand.u32 2147483648, %v655_v17  ;;  %vm660_vm3 = vcmp.eq.f32.partialorder %v655_v17, 0.0 }
 0x14f   : > { %v6025_v18 = vpop.eup %6024 }
 0x150   : > { %v657_v19 = vmul.f32 %v6025_v18, %v655_v17 }
 0x152   : > { %v659_v21 = vsel %vm658_vm2, %v655_v17, %v657_v19  ;;  %v5157_v19 = vld [vmem:[%s7264_s7] ss:$0 sm:$0xff] }
 0x153   : > { %v662_v22 = vsel %vm660_vm3, %v661_v20, %v659_v21  ;;  %v5166_v21 = vld [vmem:[%s7265_s8 + $0x1] ss:$0 sm:$0xff] }
 0x154   : > { %v670_v23 = vadd.f32 1e-06, %v662_v22 }
 0x156   : > { %6026 = vrcp.f32 %v670_v23 }
 0x163   : > { %v6027_v26 = vpop.eup %6026 }
 0x164   : > { %v672_v28 = vmul.f32 %v6027_v26, %v669_v25  ;;  %v5158_v25 = vld [vmem:[%s7264_s7 + $0x1] ss:$0 sm:$0xff] }
 0x166   : > { %v6352_v29 = vadd.f32 %v5156_v27, %v672_v28  ;;  %v5167_v28 = vld [vmem:[%s7265_s8 + $0x2] ss:$0 sm:$0xff] }
 0x168   : > { %5548 = vmatmul.mubr.msk.f32.vlgmr.msra.gmra.mxu0 %vm643_vm0, %v6352_v29  ;;  %5559 = vmatmul.mubr.msk.f32.vlgmr.msra.gmra.mxu1 %vm643_vm0, %v6352_v29 }
 0x169   : > { %5562 = vmatpush3.msra.mxu0 %v691_v30  ;;  %5573 = vmatpush3.msra.mxu1 %v695_v31 }
 0x16a   : > { %5563 = vmatprep.subr.mxu0 %v6138_v7  ;;  %5574 = vmatprep.subr.mxu1 %v6138_v7 }
 0x16b   : > { %5564 = vmatpush3.msra.mxu0 %v690_v32  ;;  %5575 = vmatpush3.msra.mxu1 %v694_v33  ;;  %v5159_v32 = vld [vmem:[%s7264_s7 + $0x2] ss:$0 sm:$0xff]  ;;  %v5160_v33 = vld [vmem:[%s7264_s7 + $0x3] ss:$0 sm:$0xff] }
 0x16c   : > { %5565 = vmatprep.subr.mxu0 %v6138_v7  ;;  %5576 = vmatprep.subr.mxu1 %v6138_v7 }
 0x16d   : > { %5566 = vmatpush3.msra.mxu0 %v689_v34  ;;  %5577 = vmatpush3.msra.mxu1 %v693_v35 }
 0x16e   : > { %5567 = vmatprep.subr.mxu0 %v6138_v7  ;;  %5578 = vmatprep.subr.mxu1 %v6138_v7 }
 0x16f   : > { %5568 = vmatpush3.msra.mxu0 %v688_v36  ;;  %5569 = vmatprep.mubr.msk.f32.mxu0 %vm6139_vm1, %v6138_v7 }
 0x170   : > { %5579 = vmatpush3.msra.mxu1 %v692_v37  ;;  %5580 = vmatprep.mubr.msk.f32.mxu1 %vm6139_vm1, %v6138_v7 }
 0x171   : > { %5570 = vmatmul.mubr.msk.f32.vlgmr.msra.gmra.mxu0 %vm643_vm0, %v6352_v29  ;;  %5581 = vmatmul.mubr.msk.f32.vlgmr.msra.gmra.mxu1 %vm643_vm0, %v6352_v29 }
 0x172   : > { %5583 = vmatprep.subr.mxu0 %v6138_v7  ;;  %5594 = vmatprep.subr.mxu1 %v6138_v7 }
 0x173   : > { %5584 = vmatpush3.msra.mxu0 %v1010_v38  ;;  %5595 = vmatpush3.msra.mxu1 %v1014_v39 }
 0x174   : > { %5585 = vmatprep.subr.mxu0 %v6138_v7  ;;  %5596 = vmatprep.subr.mxu1 %v6138_v7 }
 0x175   : > { %5586 = vmatpush3.msra.mxu0 %v1009_v40  ;;  %5597 = vmatpush3.msra.mxu1 %v1013_v41  ;;  %v5173_v40 = vld [vmem:[%s7266_s9] ss:$0 sm:$0xff]  ;;  %v5174_v41 = vld [vmem:[%s7266_s9 + $0x1] ss:$0 sm:$0xff] }
 0x176   : > { %5587 = vmatprep.subr.mxu0 %v6138_v7  ;;  %5598 = vmatprep.subr.mxu1 %v6138_v7 }
 0x177   : > { %5588 = vmatpush3.msra.mxu0 %v1008_v42  ;;  %5599 = vmatpush3.msra.mxu1 %v1012_v43 }
 0x178   : > { %5589 = vmatprep.subr.mxu0 %v6138_v7  ;;  %5600 = vmatprep.subr.mxu1 %v6138_v7 }
 0x179   : > { %5590 = vmatpush3.msra.mxu0 %v1007_v44  ;;  %5591 = vmatprep.mubr.msk.f32.mxu0 %vm6139_vm1, %v6138_v7 }
 0x17a   : > { %5601 = vmatpush3.msra.mxu1 %v1011_v45  ;;  %5602 = vmatprep.mubr.msk.f32.mxu1 %vm6139_vm1, %v6138_v7 }
 0x17b   : > { %5592 = vmatmul.mubr.msk.f32.vlgmr.msra.gmra.mxu0 %vm643_vm0, %v6352_v29  ;;  %5603 = vmatmul.mubr.msk.f32.vlgmr.msra.gmra.mxu1 %vm643_vm0, %v6352_v29 }
 0x17c   : > { %5605 = vmatprep.subr.mxu0 %v6138_v7  ;;  %5616 = vmatprep.subr.mxu1 %v6138_v7 }
 0x17d   : > { %5606 = vmatpush3.msra.mxu0 %v1018_v46  ;;  %5617 = vmatpush3.msra.mxu1 %v1022_v47 }
 0x17e   : > { %5607 = vmatprep.subr.mxu0 %v6138_v7  ;;  %5618 = vmatprep.subr.mxu1 %v6138_v7 }
 0x17f   : > { %5608 = vmatpush3.msra.mxu0 %v1017_v48  ;;  %5619 = vmatpush3.msra.mxu1 %v1021_v49 }
 0x180   : > { %5609 = vmatprep.subr.mxu0 %v6138_v7  ;;  %5620 = vmatprep.subr.mxu1 %v6138_v7 }
 0x181   : > { %5610 = vmatpush3.msra.mxu0 %v1016_v50  ;;  %5621 = vmatpush3.msra.mxu1 %v1020_v51 }
 0x182   : > { %5611 = vmatprep.subr.mxu0 %v6138_v7  ;;  %5622 = vmatprep.subr.mxu1 %v6138_v7 }
 0x183   : > { %5612 = vmatpush3.msra.mxu0 %v1015_v52  ;;  %5613 = vmatprep.mubr.msk.f32.mxu0 %vm6139_vm1, %v6138_v7  ;;  %v6622_v52 = vld [vmem:[%s638_s23] ss:$0 sm:$0xff]  ;;  %s6076_s23 = scalar_lea.vmem %s5082_s29, 128 }
 0x184   : > { %5623 = vmatpush3.msra.mxu1 %v1019_v53  ;;  %5624 = vmatprep.mubr.msk.f32.mxu1 %vm6139_vm1, %v6138_v7  ;;  %p6077_p11 = scmp.ne.s32.totalorder %s5082_s29, %s6076_s23  ;;  %p6084_p1 = scmp.lt.s32.totalorder %s6082_s2, %s6076_s23 }
 0x185   : > { %5614 = vmatmul.mubr.msk.f32.vlgmr.msra.gmra.mxu0 %vm643_vm0, %v6352_v29  ;;  %5625 = vmatmul.mubr.msk.f32.vlgmr.msra.gmra.mxu1 %vm643_vm0, %v6352_v29 }
 0x186   : > { %5627 = vmatprep.subr.mxu0 %v6138_v7  ;;  %5638 = vmatprep.subr.mxu1 %v6138_v7  ;;  %p6078_p12 = pnand %p6077_p11, %p6284_p5  ;;  %p6085_p2 = por %p6084_p1, %p6083_p0 }
 0x187   : > { %5628 = vmatpush3.msra.mxu0 %v1334_v54  ;;  %5639 = vmatpush3.msra.mxu1 %v1338_v55 }
 0x188   : > { %5629 = vmatprep.subr.mxu0 %v6138_v7  ;;  %5640 = vmatprep.subr.mxu1 %v6138_v7  ;;  %p6079_p13 = pneg %p6078_p12 }
 0x189   : > { %5630 = vmatpush3.msra.mxu0 %v1333_v56  ;;  %5641 = vmatpush3.msra.mxu1 %v1337_v57 }
 0x18a   : > { %5631 = vmatprep.subr.mxu0 %v6138_v7  ;;  %5642 = vmatprep.subr.mxu1 %v6138_v7  ;;  %p6086_p3 = pnand %p6085_p2, %p6079_p13 }
 0x18b   : > { %5632 = vmatpush3.msra.mxu0 %v1332_v58  ;;  %5643 = vmatpush3.msra.mxu1 %v1336_v59 }
 0x18c   : > { %5633 = vmatprep.subr.mxu0 %v6138_v7  ;;  %5644 = vmatprep.subr.mxu1 %v6138_v7 }
 0x18d   : > { %5634 = vmatpush3.msra.mxu0 %v1331_v60  ;;  %5635 = vmatprep.mubr.msk.f32.mxu0 %vm6139_vm1, %v6138_v7 }
 0x18e   : > { %5645 = vmatpush3.msra.mxu1 %v1335_v61  ;;  %5646 = vmatprep.mubr.msk.f32.mxu1 %vm6139_vm1, %v6138_v7 }
 0x18f   : > { %5636 = vmatmul.mubr.msk.f32.vlgmr.msra.gmra.mxu0 %vm643_vm0, %v6352_v29  ;;  %5647 = vmatmul.mubr.msk.f32.vlgmr.msra.gmra.mxu1 %vm643_vm0, %v6352_v29 }
 0x190   : > { %5649 = vmatprep.subr.mxu0 %v6138_v7  ;;  %5660 = vmatprep.subr.mxu1 %v6138_v7 }
 0x191   : > { %5650 = vmatpush3.msra.mxu0 %v1342_v62  ;;  %5661 = vmatpush3.msra.mxu1 %v1346_v63 }
 0x192   : > { %5651 = vmatprep.subr.mxu0 %v6138_v7  ;;  %5662 = vmatprep.subr.mxu1 %v6138_v7 }
 0x193   : > { %5652 = vmatpush3.msra.mxu0 %v1341_v1  ;;  %5663 = vmatpush3.msra.mxu1 %v1345_v2 }
 0x194   : > { %5653 = vmatprep.subr.mxu0 %v6138_v7  ;;  %5664 = vmatprep.subr.mxu1 %v6138_v7 }
 0x195   : > { %5654 = vmatpush3.msra.mxu0 %v1340_v3  ;;  %5665 = vmatpush3.msra.mxu1 %v1344_v4 }
 0x196   : > { %5655 = vmatprep.subr.mxu0 %v6138_v7  ;;  %5666 = vmatprep.subr.mxu1 %v6138_v7 }
 0x197   : > { %5656 = vmatpush3.msra.mxu0 %v1339_v5  ;;  %5657 = vmatprep.mubr.msk.f32.mxu0 %vm6139_vm1, %v6138_v7 }
 0x198   : > { %5667 = vmatpush3.msra.mxu1 %v1343_v6  ;;  %5668 = vmatprep.mubr.msk.f32.mxu1 %vm6139_vm1, %v6138_v7 }
 0x199   : > { %5658 = vmatmul.mubr.msk.f32.vlgmr.msra.gmra.mxu0 %vm643_vm0, %v6352_v29  ;;  %5669 = vmatmul.mubr.msk.f32.vlgmr.msra.gmra.mxu1 %vm643_vm0, %v6352_v29  ;;  %v5168_v29 = vld [vmem:[%s7265_s8 + $0x3] ss:$0 sm:$0xff] }
 0x19a   : > { %5671 = vmatprep.subr.mxu0 %v6138_v7  ;;  %5673 = vmatprep.mubr.msk.f32.mxu0 %vm6139_vm1, %v6138_v7 }
 0x19b   : > { %5686 = vmatprep.subr.mxu1 %v6138_v7  ;;  %5688 = vmatprep.mubr.msk.f32.mxu1 %vm6139_vm1, %v6138_v7 }
 0x228   : > { %v793_v8 = vpop.f32.mrf.mxu0  ;;  %v863_v9 = vpop.f32.mrf.mxu1 }
 0x229   : > { %v794_v24 = vadd.f32 %v5157_v19, %v793_v8  ;;  %v864_v27 = vadd.f32 %v5158_v25, %v863_v9 }
 0x22a   : > { %v5549_v10 = vpop.f32.mrf.mxu0  ;;  %v5560_v11 = vpop.f32.mrf.mxu1 }
 0x231   : > { %v933_v12 = vpop.f32.mrf.mxu0  ;;  %v1003_v13 = vpop.f32.mrf.mxu1 }
 0x232   : > { %v934_v38 = vadd.f32 %v5159_v32, %v933_v12  ;;  %v1004_v39 = vadd.f32 %v5160_v33, %v1003_v13 }
 0x233   : > { %v5571_v14 = vpop.f32.mrf.mxu0  ;;  %v5582_v15 = vpop.f32.mrf.mxu1 }
 0x23b   : > { %v1117_v17 = vpop.f32.mrf.mxu0  ;;  %v1187_v18 = vpop.f32.mrf.mxu1 }
 0x23c   : > { %v1118_v20 = vadd.f32 %v5165_v16, %v1117_v17  ;;  %v1188_v26 = vadd.f32 %v5166_v21, %v1187_v18 }
 0x23d   : > { %v5593_v22 = vpop.f32.mrf.mxu0  ;;  %v5604_v23 = vpop.f32.mrf.mxu1 }
 0x23e   : > { %5672 = vmatpush3.xpose.msk.msra.mxu0 %vm1655_vm4, %v1118_v20 }
 0x23f   : > { %5676 = vmatprep.subr.mxu0 %v6138_v7 }
 0x241   : > { %5674 = vmatmul.mubr.msk.f32.vlgmr.msra.gmra.mxu0 %vm1655_vm4, %v794_v24 }
 0x242   : > { %5677 = vmatpush3.xpose.msk.msra.mxu0 %vm1655_vm4, %v1188_v26  ;;  %5678 = vmatprep.mubr.msk.f32.mxu0 %vm6139_vm1, %v6138_v7 }
 0x243   : > { %5681 = vmatprep.subr.mxu0 %v6138_v7 }
 0x245   : > { %v1257_v30 = vpop.f32.mrf.mxu0  ;;  %v1327_v31 = vpop.f32.mrf.mxu1  ;;  %5679 = vmatmul.mubr.msk.f32.vlgmr.msra.gmra.mxu0 %vm1655_vm4, %v864_v27 }
 0x246   : > { %v1258_v34 = vadd.f32 %v5167_v28, %v1257_v30  ;;  %v1328_v35 = vadd.f32 %v5168_v29, %v1327_v31  ;;  %5683 = vmatprep.mubr.msk.f32.mxu0 %vm6139_vm1, %v6138_v7 }
 0x247   : > { %v5615_v36 = vpop.f32.mrf.mxu0  ;;  %v5626_v37 = vpop.f32.mrf.mxu1 }
 0x248   : > { %5682 = vmatpush3.xpose.msk.msra.mxu0 %vm1655_vm4, %v1258_v34  ;;  %5687 = vmatpush3.xpose.msk.msra.mxu1 %vm1655_vm4, %v1328_v35  ;;  %v5175_v35 = vld [vmem:[%s7266_s9 + $0x2] ss:$0 sm:$0xff] }
 0x249   : > { %5691 = vmatprep.subr.mxu0 %v6138_v7  ;;  %5696 = vmatprep.subr.mxu1 %v6138_v7 }
 0x24b   : > { %5684 = vmatmul.mubr.msk.f32.vlgmr.msra.gmra.mxu0 %vm1655_vm4, %v934_v38  ;;  %5689 = vmatmul.mubr.msk.f32.vlgmr.msra.gmra.mxu1 %vm1655_vm4, %v1004_v39  ;;  %v5176_v39 = vld [vmem:[%s7266_s9 + $0x3] ss:$0 sm:$0xff] }
 0x24c   : > { %5693 = vmatprep.mubr.msk.f32.mxu0 %vm6139_vm1, %v6138_v7  ;;  %5698 = vmatprep.mubr.msk.f32.mxu1 %vm6139_vm1, %v6138_v7 }
 0x24f   : > { %v1441_v42 = vpop.f32.mrf.mxu0  ;;  %v1511_v43 = vpop.f32.mrf.mxu1 }
 0x250   : > { %v1442_v44 = vadd.f32 %v5173_v40, %v1441_v42  ;;  %v1512_v45 = vadd.f32 %v5174_v41, %v1511_v43 }
 0x251   : > { %v5637_v46 = vpop.f32.mrf.mxu0  ;;  %v5648_v47 = vpop.f32.mrf.mxu1 }
 0x252   : > { %5692 = vmatpush3.msra.mxu0 %v1442_v44  ;;  %5697 = vmatpush3.msra.mxu1 %v1512_v45  ;;  %v2310_v47 = vld [vmem:[%s7267_s10] sm:$0xff] }
 0x253   : > { %5701 = vmatprep.subr.mxu0 %v6138_v7  ;;  %5706 = vmatprep.subr.mxu1 %v6138_v7 }
 0x259   : > { %v6614_v48 = vpop.f32.mrf.mxu0  ;;  %v6616_v49 = vpop.f32.mrf.mxu1 }
 0x25a   : > { %v1582_v38 = vadd.f32 %v5175_v35, %v6614_v48  ;;  %v1652_v42 = vadd.f32 %v5176_v39, %v6616_v49  ;;  %v2311_v48 = vld [vmem:[%s7267_s10 + $0x8] sm:$0xff]  ;;  %v2312_v49 = vld [vmem:[%s7267_s10 + $0x10] sm:$0xff] }
 0x25b   : > { %v5659_v50 = vpop.f32.mrf.mxu0  ;;  %v5670_v51 = vpop.f32.mrf.mxu1 }
 0x301   : > { %v1728_v53 = vpop.f32.mrf.mxu0 }
 0x302   : > { %v1960_v54 = vmul.f32 0.35355338, %v1728_v53  ;;  %v2313_v53 = vld [vmem:[%s7267_s10 + $0x18] sm:$0xff] }
 0x303   : > { %v5675_v55 = vpop.f32.mrf.mxu0 }
 0x304   : > { %v1970_v56 = vadd.f32 %v6622_v52, %v1960_v54 }
 0x305   : > { %v1804_v57 = vpop.f32.mrf.mxu0 }
 0x306   : > { %v1961_v58 = vmul.f32 0.35355338, %v1804_v57  ;;  %v1974_v59 = vsel %vm1655_vm4, %v1970_v56, -inf }
 0x307   : > { %1975 = vmax.xlane.f32.xlu1 %v1974_v59  ;;  %v5680_v60 = vpop.f32.mrf.mxu0 }
 0x308   : > { %v1971_v61 = vadd.f32 %v6622_v52, %v1961_v58 }
 0x30a   : > { %v1977_v62 = vsel %vm1655_vm4, %v1971_v61, -inf }
 0x30b   : > { %v1880_v63 = vpop.f32.mrf.mxu0  ;;  %v1956_v1 = vpop.f32.mrf.mxu1  ;;  %1978 = vmax.xlane.f32.xlu1 %v1977_v62 }
 0x30c   : > { %v1962_v2 = vmul.f32 0.35355338, %v1880_v63  ;;  %v1963_v3 = vmul.f32 0.35355338, %v1956_v1 }
 0x30d   : > { %v5690_v4 = vpop.f32.mrf.mxu1  ;;  %v5685_v5 = vpop.f32.mrf.mxu0 }
 0x30e   : > { %v1973_v6 = vadd.f32 %v6622_v52, %v1963_v3  ;;  %v1972_v8 = vadd.f32 %v6622_v52, %v1962_v2 }
 0x310   : > { %v1983_v9 = vsel %vm1655_vm4, %v1973_v6, -inf  ;;  %v1980_v10 = vsel %vm1655_vm4, %v1972_v8, -inf }
 0x311   : > { %1984 = vmax.xlane.f32.xlu1 %v1983_v9  ;;  %1981 = vmax.xlane.f32.xlu0 %v1980_v10 }
 0x390   : > { %v1976_v11 = vpop.xlane.xlu1 %1975 }
 0x391   : > { %v1986_v12 = vsub.f32 %v1970_v56, %v1976_v11 }
 0x393   : > { %v1990_v13 = vmul.f32 1.442695, %v1986_v12 }
 0x394   : > { %v1979_v14 = vpop.xlane.xlu1 %1978 }
 0x395   : > { %6028 = vpow2.f32 %v1990_v13  ;;  %v1987_v15 = vsub.f32 %v1971_v61, %v1979_v14  ;;  %v5198_v13 = vld [vmem:[%s7268_s11] ss:$0 sm:$0xff] }
 0x397   : > { %v1992_v16 = vmul.f32 1.442695, %v1987_v15 }
 0x399   : > { %6030 = vpow2.f32 %v1992_v16 }
 0x39a   : > { %v1985_v17 = vpop.xlane.xlu1 %1984  ;;  %v1982_v18 = vpop.xlane.xlu0 %1981 }
 0x39b   : > { %v1989_v19 = vsub.f32 %v1973_v6, %v1985_v17  ;;  %v1988_v20 = vsub.f32 %v1972_v8, %v1982_v18 }
 0x39d   : > { %v1996_v21 = vmul.f32 1.442695, %v1989_v19  ;;  %v1994_v22 = vmul.f32 1.442695, %v1988_v20 }
 0x39f   : > { %6032 = vpow2.f32 %v1996_v21 }
 0x3a0   : > { %6034 = vpow2.f32 %v1994_v22  ;;  %v2661_v22 = vld [vmem:[%s7271_s14 + $0x18] sm:$0xff] }
 0x3a2   : > { %v6029_v23 = vpop.eup %6028 }
 0x3a3   : > { %v1998_v24 = vsel %vm1655_vm4, %v6029_v23, 0.0 }
 0x3a4   : > { %1999 = vadd.xlane.f32.xlu0 %v1998_v24  ;;  %v2658_v24 = vld [vmem:[%s7271_s14] sm:$0xff] }
 0x3a6   : > { %v6031_v25 = vpop.eup %6030 }
 0x3a7   : > { %v2001_v26 = vsel %vm1655_vm4, %v6031_v25, 0.0 }
 0x3a8   : > { %2002 = vadd.xlane.f32.xlu1 %v2001_v26  ;;  %v2749_v26 = vld [vmem:[%s7273_s16 + $0x30] sm:$0xff] }
 0x3ac   : > { %v6033_v27 = vpop.eup %6032 }
 0x3ad   : > { %v6035_v28 = vpop.eup %6034  ;;  %v2007_v29 = vsel %vm1655_vm4, %v6033_v27, 0.0 }
 0x3ae   : > { %2008 = vadd.xlane.f32.xlu1 %v2007_v29  ;;  %v2004_v30 = vsel %vm1655_vm4, %v6035_v28, 0.0  ;;  %v2746_v29 = vld [vmem:[%s7273_s16 + $0x18] sm:$0xff] }
 0x3af   : > { %2005 = vadd.xlane.f32.xlu0 %v2004_v30 }
 0x42d   : > { %v2000_v31 = vpop.xlane.xlu0 %1999 }
 0x42e   : > { %6036 = vrcp.f32 %v2000_v31 }
 0x431   : > { %v2003_v32 = vpop.xlane.xlu1 %2002 }
 0x432   : > { %6038 = vrcp.f32 %v2003_v32 }
 0x437   : > { %v2009_v33 = vpop.xlane.xlu1 %2008 }
 0x438   : > { %6040 = vrcp.f32 %v2009_v33  ;;  %v2006_v34 = vpop.xlane.xlu0 %2005 }
 0x439   : > { %6042 = vrcp.f32 %v2006_v34 }
 0x43b   : > { %v6037_v36 = vpop.eup %6036 }
 0x43c   : > { %v2011_v37 = vmul.f32 %v6037_v36, %v6029_v23  ;;  %v2659_v23 = vld [vmem:[%s7271_s14 + $0x8] sm:$0xff] }
 0x43e   : > { %5694 = vmatmul.mubr.msk.f32.vlgmr.msra.gmra.mxu0 %vm1655_vm4, %v2011_v37 }
 0x43f   : > { %v6039_v40 = vpop.eup %6038  ;;  %5702 = vmatpush3.msra.mxu0 %v1582_v38  ;;  %5703 = vmatprep.mubr.msk.f32.mxu0 %vm6139_vm1, %v6138_v7  ;;  %v5199_v38 = vld [vmem:[%s7269_s12] ss:$0 sm:$0xff] }
 0x440   : > { %v2013_v41 = vmul.f32 %v6039_v40, %v6031_v25  ;;  %5711 = vmatprep.subr.mxu0 %v6138_v7  ;;  %v2750_v25 = vld [vmem:[%s7273_s16 + $0x38] sm:$0xff] }
 0x442   : > { %5699 = vmatmul.mubr.msk.f32.vlgmr.msra.gmra.mxu1 %vm1655_vm4, %v2013_v41  ;;  %v5200_v41 = vld [vmem:[%s7270_s13] ss:$0 sm:$0xff] }
 0x443   : > { %5707 = vmatpush3.msra.mxu1 %v1652_v42  ;;  %5708 = vmatprep.mubr.msk.f32.mxu1 %vm6139_vm1, %v6138_v7 }
 0x444   : > { %5716 = vmatprep.subr.mxu1 %v6138_v7 }
 0x445   : > { %v6041_v43 = vpop.eup %6040 }
 0x446   : > { %v6043_v44 = vpop.eup %6042  ;;  %v2017_v45 = vmul.f32 %v6041_v43, %v6033_v27  ;;  %v2748_v27 = vld [vmem:[%s7273_s16 + $0x28] sm:$0xff] }
 0x447   : > { %v2015_v46 = vmul.f32 %v6043_v44, %v6035_v28  ;;  %v2747_v28 = vld [vmem:[%s7273_s16 + $0x20] sm:$0xff]  ;;  %v2745_v44 = vld [vmem:[%s7273_s16 + $0x10] sm:$0xff] }
 0x448   : > { %5709 = vmatmul.mubr.msk.f32.vlgmr.msra.gmra.mxu1 %vm1655_vm4, %v2017_v45  ;;  %v2744_v45 = vld [vmem:[%s7273_s16 + $0x8] sm:$0xff] }
 0x449   : > { %5704 = vmatmul.mubr.msk.f32.vlgmr.msra.gmra.mxu0 %vm1655_vm4, %v2015_v46  ;;  %5718 = vmatprep.mubr.msk.f32.mxu1 %vm6139_vm1, %v6138_v7  ;;  %v2743_v46 = vld [vmem:[%s7273_s16] sm:$0xff] }
 0x44a   : > { %5713 = vmatprep.mubr.msk.f32.mxu0 %vm6139_vm1, %v6138_v7  ;;  %5712 = vmatpush3.msra.mxu0 %v2310_v47  ;;  %v5201_v47 = vld [vmem:[%s7272_s15] ss:$0 sm:$0xff] }
 0x44b   : > { %5721 = vmatprep.subr.mxu0 %v6138_v7  ;;  %5717 = vmatpush3.msra.mxu1 %v2311_v48 }
 0x44c   : > { %5726 = vmatprep.subr.mxu1 %v6138_v7 }
 0x4fe   : > { %v2087_v50 = vpop.f32.mrf.mxu0 }
 0x4ff   : > { %5714 = vmatmul.mubr.msk.f32.vlgmr.msra.gmra.mxu0 %vm1655_vm4, %v2087_v50 }
 0x500   : > { %v5695_v51 = vpop.f32.mrf.mxu0  ;;  %5722 = vmatpush3.msra.mxu0 %v2312_v49  ;;  %5723 = vmatprep.mubr.msk.f32.mxu0 %vm6139_vm1, %v6138_v7 }
 0x501   : > { %5731 = vmatprep.subr.mxu0 %v6138_v7 }
 0x502   : > { %v2160_v54 = vpop.f32.mrf.mxu1 }
 0x503   : > { %5719 = vmatmul.mubr.msk.f32.vlgmr.msra.gmra.mxu1 %vm1655_vm4, %v2160_v54 }
 0x504   : > { %v5700_v55 = vpop.f32.mrf.mxu1  ;;  %5727 = vmatpush3.msra.mxu1 %v2313_v53  ;;  %5728 = vmatprep.mubr.msk.f32.mxu1 %vm6139_vm1, %v6138_v7  ;;  %v5203_v53 = vld [vmem:[%s7274_s17] ss:$0 sm:$0xff] }
 0x505   : > { %5742 = vmatprep.subr.mxu1 %v6138_v7 }
 0x508   : > { %v2306_v56 = vpop.f32.mrf.mxu1 }
 0x509   : > { %v2233_v57 = vpop.f32.mrf.mxu0  ;;  %5729 = vmatmul.mubr.msk.f32.vlgmr.msra.gmra.mxu1 %vm1655_vm4, %v2306_v56 }
 0x50a   : > { %5724 = vmatmul.mubr.msk.f32.vlgmr.msra.gmra.mxu0 %vm1655_vm4, %v2233_v57  ;;  %v5710_v58 = vpop.f32.mrf.mxu1  ;;  %5758 = vmatprep.mubr.msk.f32.mxu1 %vm6139_vm1, %v6138_v7 }
 0x50b   : > { %v5705_v59 = vpop.f32.mrf.mxu0  ;;  %5739 = vmatprep.mubr.msk.f32.mxu0 %vm6139_vm1, %v6138_v7  ;;  %5732 = vmatpush3.msra.mxu0 %v2661_v22 }
 0x50c   : > { %5733 = vmatprep.subr.mxu0 %v6138_v7  ;;  %5743 = vmatpush3.msra.mxu1 %v2750_v25  ;;  %v5215_v25 = vld [vmem:[%s7304_s25 + $0xb0] sm:$0xff] }
 0x50d   : > { %5744 = vmatprep.subr.mxu1 %v6138_v7 }
 0x50e   : > { %5745 = vmatpush3.msra.mxu1 %v2749_v26  ;;  %v5239_v26 = vld [vmem:[%s7307_s5 + $0x90] sm:$0xff] }
 0x50f   : > { %5746 = vmatprep.subr.mxu1 %v6138_v7 }
 0x510   : > { %5747 = vmatpush3.msra.mxu1 %v2748_v27  ;;  %v5214_v27 = vld [vmem:[%s7304_s25 + $0xa8] sm:$0xff] }
 0x511   : > { %5748 = vmatprep.subr.mxu1 %v6138_v7 }
 0x512   : > { %5749 = vmatpush3.msra.mxu1 %v2747_v28  ;;  %v5238_v28 = vld [vmem:[%s7307_s5 + $0x88] sm:$0xff] }
 0x513   : > { %5750 = vmatprep.subr.mxu1 %v6138_v7 }
 0x514   : > { %5751 = vmatpush3.msra.mxu1 %v2746_v29  ;;  %v5213_v29 = vld [vmem:[%s7304_s25 + $0xa0] sm:$0xff] }
 0x515   : > { %5752 = vmatprep.subr.mxu1 %v6138_v7 }
 0x516   : > { %5753 = vmatpush3.msra.mxu1 %v2745_v44  ;;  %v5266_v44 = vld [vmem:[%s7308_s6 + $0x88] sm:$0xff] }
 0x517   : > { %5754 = vmatprep.subr.mxu1 %v6138_v7 }
 0x518   : > { %5755 = vmatpush3.msra.mxu1 %v2744_v45  ;;  %v5241_v45 = vld [vmem:[%s7307_s5 + $0xa0] sm:$0xff] }
 0x519   : > { %5756 = vmatprep.subr.mxu1 %v6138_v7 }
 0x51a   : > { %5757 = vmatpush3.msra.mxu1 %v2743_v46  ;;  %v5265_v46 = vld [vmem:[%s7308_s6 + $0x80] sm:$0xff] }
 0x51b   : > { %5783 = vmatprep.subr.mxu1 %v6138_v7 }
 0x5bf   : > { %v2383_v60 = vpop.f32.mrf.mxu0 }
 0x5c0   : > { %v2606_v2 = vsel %vm643_vm0, %v2383_v60, 0.0 }
 0x5c1   : > { %v5715_v61 = vpop.f32.mrf.mxu0 }
 0x5c3   : > { %v2456_v62 = vpop.f32.mrf.mxu1 }
 0x5c4   : > { %v2607_v1 = vsel %vm643_vm0, %v2456_v62, 0.0 }
 0x5c5   : > { %v5720_v63 = vpop.f32.mrf.mxu1  ;;  %v2608_v4 = vadd.f32 %v2607_v1, %v2606_v2  ;;  %v5212_v1 = vld [vmem:[%s7304_s25 + $0x98] sm:$0xff] }
 0x5c6   : > { %v5220_v2 = vld [vmem:[%s7304_s25 + $0xd8] sm:$0xff] }
 0x5c9   : > { %v2602_v3 = vpop.f32.mrf.mxu1 }
 0x5ca   : > { %v2529_v5 = vpop.f32.mrf.mxu0  ;;  %v2611_v11 = vsel %vm643_vm0, %v2602_v3, 0.0  ;;  %v5211_v3 = vld [vmem:[%s7304_s25 + $0x90] sm:$0xff] }
 0x5cb   : > { %v2609_v6 = vsel %vm643_vm0, %v2529_v5, 0.0  ;;  %v5730_v8 = vpop.f32.mrf.mxu1  ;;  %v5210_v5 = vld [vmem:[%s7304_s25 + $0x88] sm:$0xff] }
 0x5cc   : > { %v2610_v9 = vadd.f32 %v2609_v6, %v2608_v4  ;;  %v5725_v10 = vpop.f32.mrf.mxu0  ;;  %v5219_v4 = vld [vmem:[%s7304_s25 + $0xd0] sm:$0xff]  ;;  %v5218_v6 = vld [vmem:[%s7304_s25 + $0xc8] sm:$0xff]  ;;  %v5209_v8 = vld [vmem:[%s7304_s25 + $0x80] sm:$0xff] }
 0x5ce   : > { %v2612_v12 = vadd.f32 %v2611_v11, %v2610_v9  ;;  %v5217_v9 = vld [vmem:[%s7304_s25 + $0xc0] sm:$0xff] }
 0x5d0   : > { %v2613_v14 = vadd.f32 %v2612_v12, %v6302_v0  ;;  %v2660_v0 = vld [vmem:[%s7271_s14 + $0x10] sm:$0xff] }
 0x5d1   : > { %5734 = vmatpush3.msra.mxu0 %v2660_v0 }
 0x5d2   : > { %v6694_v15 = vadd.f32 %v5198_v13, %v2613_v14  ;;  %5735 = vmatprep.subr.mxu0 %v6138_v7 }
 0x5d3   : > { %5736 = vmatpush3.msra.mxu0 %v2659_v23  ;;  %v5216_v23 = vld [vmem:[%s7304_s25 + $0xb8] sm:$0xff] }
 0x5d4   : > { %v2624_v16 = vsel %vm643_vm0, %v6694_v15, 0.0  ;;  %5737 = vmatprep.subr.mxu0 %v6138_v7 }
 0x5d5   : > { %2625 = vadd.xlane.f32.xlu0 %v2624_v16  ;;  %5738 = vmatpush3.msra.mxu0 %v2658_v24  ;;  %v5240_v24 = vld [vmem:[%s7307_s5 + $0x98] sm:$0xff] }
 0x5d6   : > { %5761 = vmatprep.subr.mxu0 %v6138_v7 }
 0x65e   : > { %v2626_v17 = vpop.xlane.xlu0 %2625 }
 0x65f   : > { %v2627_v18 = vmul.f32 0.03125, %v2626_v17 }
 0x661   : > { %v2628_v19 = vsub.f32 %v6694_v15, %v2627_v18  ;;  %v5207_v18 = vld [vmem:[%s7305_s26 + $0x1] ss:$0 sm:$0xff] }
 0x663   : > { %v2629_v20 = vmul.f32 %v2628_v19, %v2628_v19  ;;  %v2647_v39 = vmul.f32 %v5199_v38, %v2628_v19  ;;  %v5245_v38 = vld [vmem:[%s7307_s5 + $0xc0] sm:$0xff] }
 0x665   : > { %v2630_v21 = vsel %vm643_vm0, %v2629_v20, 0.0 }
 0x666   : > { %2631 = vadd.xlane.f32.xlu1 %v2630_v21  ;;  %v5208_v21 = vld [vmem:[%s7306_s3 + $0x1] ss:$0 sm:$0xff] }
 0x6ef   : > { %v2632_v30 = vpop.xlane.xlu1 %2631 }
 0x6f0   : > { %v2633_v31 = vmul.f32 0.032258064, %v2632_v30  ;;  %v5237_v30 = vld [vmem:[%s7307_s5 + $0x80] sm:$0xff] }
 0x6f2   : > { %6044 = vrsqrt.f32 %v2633_v31  ;;  %vm2636_vm5 = vcmp.eq.f32.partialorder %v2633_v31, inf  ;;  %v2639_v34 = vand.u32 2147483648, %v2633_v31  ;;  %vm2638_vm6 = vcmp.eq.f32.partialorder %v2633_v31, 0.0 }
 0x6ff   : > { %v6045_v32 = vpop.eup %6044 }
 0x700   : > { %v2635_v33 = vmul.f32 %v6045_v32, %v2633_v31  ;;  %v5248_v32 = vld [vmem:[%s7307_s5 + $0xd8] sm:$0xff] }
 0x702   : > { %v2637_v35 = vsel %vm2636_vm5, %v2633_v31, %v2635_v33  ;;  %v5224_v31 = vld [vmem:[%s7304_s25 + $0xf8] sm:$0xff]  ;;  %v5223_v33 = vld [vmem:[%s7304_s25 + $0xf0] sm:$0xff] }
 0x703   : > { %v2640_v36 = vsel %vm2638_vm6, %v2639_v34, %v2637_v35  ;;  %v5247_v34 = vld [vmem:[%s7307_s5 + $0xd0] sm:$0xff]  ;;  %v5222_v35 = vld [vmem:[%s7304_s25 + $0xe8] sm:$0xff] }
 0x704   : > { %v2648_v37 = vadd.f32 1e-06, %v2640_v36  ;;  %v5246_v36 = vld [vmem:[%s7307_s5 + $0xc8] sm:$0xff] }
 0x706   : > { %6046 = vrcp.f32 %v2648_v37  ;;  %v5221_v37 = vld [vmem:[%s7304_s25 + $0xe0] sm:$0xff] }
 0x713   : > { %v6047_v40 = vpop.eup %6046 }
 0x714   : > { %v2650_v42 = vmul.f32 %v6047_v40, %v2647_v39  ;;  %v5244_v39 = vld [vmem:[%s7307_s5 + $0xb8] sm:$0xff] }
 0x715   : > { %v5268_v40 = vld [vmem:[%s7308_s6 + $0x98] sm:$0xff] }
 0x716   : > { %v2657_v43 = vadd.f32 %v5200_v41, %v2650_v42  ;;  %v5243_v41 = vld [vmem:[%s7307_s5 + $0xb0] sm:$0xff] }
 0x717   : > { %v5267_v42 = vld [vmem:[%s7308_s6 + $0x90] sm:$0xff] }
 0x718   : > { %5740 = vmatmul.mubr.msk.f32.vlgmr.msra.gmra.mxu0 %vm643_vm0, %v2657_v43  ;;  %v5242_v43 = vld [vmem:[%s7307_s5 + $0xa8] sm:$0xff] }
 0x719   : > { %5769 = vmatprep.mubr.msk.f32.mxu0 %vm6139_vm1, %v6138_v7  ;;  %5762 = vmatpush3.msra.mxu0 %v5212_v1  ;;  %v5277_v1 = vld [vmem:[%s7308_s6 + $0xe0] sm:$0xff] }
 0x71a   : > { %5763 = vmatprep.subr.mxu0 %v6138_v7 }
 0x71b   : > { %5764 = vmatpush3.msra.mxu0 %v5211_v3 }
 0x71c   : > { %5765 = vmatprep.subr.mxu0 %v6138_v7 }
 0x71d   : > { %5766 = vmatpush3.msra.mxu0 %v5210_v5 }
 0x71e   : > { %5767 = vmatprep.subr.mxu0 %v6138_v7 }
 0x71f   : > { %5768 = vmatpush3.msra.mxu0 %v5209_v8 }
 0x720   : > { %5772 = vmatprep.subr.mxu0 %v6138_v7 }
 0x7d8   : > { %v2738_v48 = vpop.f32.mrf.mxu0 }
 0x7d9   : > { %v2739_v49 = vadd.f32 %v5201_v47, %v2738_v48  ;;  %v5252_v47 = vld [vmem:[%s7307_s5 + $0xf8] sm:$0xff] }
 0x7da   : > { %v5741_v50 = vpop.f32.mrf.mxu0  ;;  %v5276_v48 = vld [vmem:[%s7308_s6 + $0xd8] sm:$0xff] }
 0x7db   : > { %v2742_v51 = vmax.f32 %v2739_v49, 0.0  ;;  %v5251_v49 = vld [vmem:[%s7307_s5 + $0xf0] sm:$0xff] }
 0x7dc   : > { %v5275_v50 = vld [vmem:[%s7308_s6 + $0xd0] sm:$0xff] }
 0x7dd   : > { %5759 = vmatmul.mubr.msk.f32.vlgmr.msra.gmra.mxu1 %vm2758_vm7, %v2742_v51  ;;  %v5250_v51 = vld [vmem:[%s7307_s5 + $0xe8] sm:$0xff] }
 0x7de   : > { %5791 = vmatprep.mubr.msk.f32.mxu1 %vm6139_vm1, %v6138_v7  ;;  %5784 = vmatpush3.msra.mxu1 %v5220_v2 }
 0x7df   : > { %5785 = vmatprep.subr.mxu1 %v6138_v7 }
 0x7e0   : > { %5786 = vmatpush3.msra.mxu1 %v5219_v4 }
 0x7e1   : > { %5787 = vmatprep.subr.mxu1 %v6138_v7 }
 0x7e2   : > { %5788 = vmatpush3.msra.mxu1 %v5218_v6  ;;  %v5257_v6 = vld [vmem:[%s7265_s8 + $0x4] ss:$0 sm:$0xff] }
 0x7e3   : > { %5789 = vmatprep.subr.mxu1 %v6138_v7 }
 0x7e4   : > { %5790 = vmatpush3.msra.mxu1 %v5217_v9 }
 0x7e5   : > { %5805 = vmatprep.subr.mxu1 %v6138_v7 }
 0x89d   : > { %v2828_v54 = vpop.f32.mrf.mxu1 }
 0x89e   : > { %v2829_v55 = vadd.f32 %v5203_v53, %v2828_v54  ;;  %v5274_v53 = vld [vmem:[%s7308_s6 + $0xc8] sm:$0xff]  ;;  %v5249_v54 = vld [vmem:[%s7307_s5 + $0xe0] sm:$0xff] }
 0x89f   : > { %v5760_v56 = vpop.f32.mrf.mxu1 }
 0x8a0   : > { %v6767_v57 = vadd.f32 %v2829_v55, %v6694_v15  ;;  %v5273_v55 = vld [vmem:[%s7308_s6 + $0xc0] sm:$0xff]  ;;  %v5272_v56 = vld [vmem:[%s7308_s6 + $0xb8] sm:$0xff] }
 0x8a2   : > { %v2837_v58 = vsel %vm643_vm0, %v6767_v57, 0.0 }
 0x8a3   : > { %2838 = vadd.xlane.f32.xlu0 %v2837_v58  ;;  %v5271_v58 = vld [vmem:[%s7308_s6 + $0xb0] sm:$0xff] }
 0x92c   : > { %v2839_v59 = vpop.xlane.xlu0 %2838 }
 0x92d   : > { %v2840_v60 = vmul.f32 0.03125, %v2839_v59  ;;  %v5270_v59 = vld [vmem:[%s7308_s6 + $0xa8] sm:$0xff] }
 0x92f   : > { %v2841_v61 = vsub.f32 %v6767_v57, %v2840_v60  ;;  %v5269_v60 = vld [vmem:[%s7308_s6 + $0xa0] sm:$0xff] }
 0x931   : > { %v2842_v62 = vmul.f32 %v2841_v61, %v2841_v61  ;;  %v2860_v19 = vmul.f32 %v5207_v18, %v2841_v61  ;;  %v5280_v61 = vld [vmem:[%s7308_s6 + $0xf8] sm:$0xff]  ;;  %v5231_v18 = vld [vmem:[%s7264_s7 + $0x6] ss:$0 sm:$0xff] }
 0x933   : > { %v2843_v63 = vsel %vm643_vm0, %v2842_v62, 0.0  ;;  %v5279_v62 = vld [vmem:[%s7308_s6 + $0xf0] sm:$0xff] }
 0x934   : > { %2844 = vadd.xlane.f32.xlu1 %v2843_v63  ;;  %v5278_v63 = vld [vmem:[%s7308_s6 + $0xe8] sm:$0xff]  ;;  %s5079_s6 = scalar_lea.hbm %s7277_s20, %s5340_s24 }
 0x9bd   : > { %v2845_v10 = vpop.xlane.xlu1 %2844 }
 0x9be   : > { %v2846_v11 = vmul.f32 0.032258064, %v2845_v10  ;;  %v5229_v10 = vld [vmem:[%s7264_s7 + $0x4] ss:$0 sm:$0xff] }
 0x9c0   : > { %6048 = vrsqrt.f32 %v2846_v11  ;;  %vm2849_vm8 = vcmp.eq.f32.partialorder %v2846_v11, inf  ;;  %v2852_v14 = vand.u32 2147483648, %v2846_v11  ;;  %vm2851_vm9 = vcmp.eq.f32.partialorder %v2846_v11, 0.0 }
 0x9cd   : > { %v6049_v12 = vpop.eup %6048 }
 0x9ce   : > { %v2848_v13 = vmul.f32 %v6049_v12, %v2846_v11 }
 0x9d0   : > { %v2850_v15 = vsel %vm2849_vm8, %v2846_v11, %v2848_v13 }
 0x9d1   : > { %v2853_v16 = vsel %vm2851_vm9, %v2852_v14, %v2850_v15  ;;  %v5259_v15 = vld [vmem:[%s7265_s8 + $0x6] ss:$0 sm:$0xff] }
 0x9d2   : > { %v2861_v17 = vadd.f32 1e-06, %v2853_v16 }
 0x9d4   : > { %6050 = vrcp.f32 %v2861_v17 }
 0x9e1   : > { %v6051_v20 = vpop.eup %6050 }
 0x9e2   : > { %v2863_v22 = vmul.f32 %v6051_v20, %v2860_v19 }
 0x9e4   : > { %v6811_v0 = vadd.f32 %v5208_v21, %v2863_v22 }
 0x9e6   : > { %5770 = vmatmul.mubr.msk.f32.vlgmr.msra.gmra.mxu0 %vm643_vm0, %v6811_v0  ;;  %5792 = vmatmul.mubr.msk.f32.vlgmr.msra.gmra.mxu1 %vm643_vm0, %v6811_v0 }
 0x9e7   : > { %5773 = vmatpush3.msra.mxu0 %v5216_v23  ;;  %5806 = vmatpush3.msra.mxu1 %v5240_v24  ;;  %v5285_v23 = vld [vmem:[%s7266_s9 + $0x4] ss:$0 sm:$0xff] }
 0x9e8   : > { %5774 = vmatprep.subr.mxu0 %v6138_v7  ;;  %5807 = vmatprep.subr.mxu1 %v6138_v7 }
 0x9e9   : > { %5775 = vmatpush3.msra.mxu0 %v5215_v25  ;;  %5808 = vmatpush3.msra.mxu1 %v5239_v26  ;;  %v5230_v25 = vld [vmem:[%s7264_s7 + $0x5] ss:$0 sm:$0xff] }
 0x9ea   : > { %5776 = vmatprep.subr.mxu0 %v6138_v7  ;;  %5809 = vmatprep.subr.mxu1 %v6138_v7 }
 0x9eb   : > { %5777 = vmatpush3.msra.mxu0 %v5214_v27  ;;  %5810 = vmatpush3.msra.mxu1 %v5238_v28 }
 0x9ec   : > { %5778 = vmatprep.subr.mxu0 %v6138_v7  ;;  %5811 = vmatprep.subr.mxu1 %v6138_v7 }
 0x9ed   : > { %5779 = vmatpush3.msra.mxu0 %v5213_v29  ;;  %5780 = vmatprep.mubr.msk.f32.mxu0 %vm6139_vm1, %v6138_v7 }
 0x9ee   : > { %5812 = vmatpush3.msra.mxu1 %v5237_v30  ;;  %5813 = vmatprep.mubr.msk.f32.mxu1 %vm6139_vm1, %v6138_v7 }
 0x9ef   : > { %5781 = vmatmul.mubr.msk.f32.vlgmr.msra.gmra.mxu0 %vm643_vm0, %v6811_v0  ;;  %5794 = vmatprep.subr.mxu0 %v6138_v7 }
 0x9f0   : > { %5814 = vmatmul.mubr.msk.f32.vlgmr.msra.gmra.mxu1 %vm643_vm0, %v6811_v0  ;;  %5827 = vmatprep.subr.mxu1 %v6138_v7 }
 0x9f1   : > { %5795 = vmatpush3.msra.mxu0 %v5224_v31  ;;  %5828 = vmatpush3.msra.mxu1 %v5248_v32  ;;  %v5260_v32 = vld [vmem:[%s7265_s8 + $0x7] ss:$0 sm:$0xff] }
 0x9f2   : > { %5796 = vmatprep.subr.mxu0 %v6138_v7  ;;  %5829 = vmatprep.subr.mxu1 %v6138_v7 }
 0x9f3   : > { %5797 = vmatpush3.msra.mxu0 %v5223_v33  ;;  %5830 = vmatpush3.msra.mxu1 %v5247_v34  ;;  %v5232_v34 = vld [vmem:[%s7264_s7 + $0x7] ss:$0 sm:$0xff] }
 0x9f4   : > { %5798 = vmatprep.subr.mxu0 %v6138_v7  ;;  %5831 = vmatprep.subr.mxu1 %v6138_v7 }
 0x9f5   : > { %5799 = vmatpush3.msra.mxu0 %v5222_v35  ;;  %5832 = vmatpush3.msra.mxu1 %v5246_v36 }
 0x9f6   : > { %5800 = vmatprep.subr.mxu0 %v6138_v7  ;;  %5833 = vmatprep.subr.mxu1 %v6138_v7 }
 0x9f7   : > { %5801 = vmatpush3.msra.mxu0 %v5221_v37  ;;  %5802 = vmatprep.mubr.msk.f32.mxu0 %vm6139_vm1, %v6138_v7 }
 0x9f8   : > { %5834 = vmatpush3.msra.mxu1 %v5245_v38  ;;  %5835 = vmatprep.mubr.msk.f32.mxu1 %vm6139_vm1, %v6138_v7 }
 0x9f9   : > { %5803 = vmatmul.mubr.msk.f32.vlgmr.msra.gmra.mxu0 %vm643_vm0, %v6811_v0  ;;  %5816 = vmatprep.subr.mxu0 %v6138_v7 }
 0x9fa   : > { %5836 = vmatmul.mubr.msk.f32.vlgmr.msra.gmra.mxu1 %vm643_vm0, %v6811_v0  ;;  %5849 = vmatprep.subr.mxu1 %v6138_v7 }
 0x9fb   : > { %5817 = vmatpush3.msra.mxu0 %v5244_v39  ;;  %5850 = vmatpush3.msra.mxu1 %v5268_v40  ;;  %v5286_v40 = vld [vmem:[%s7266_s9 + $0x5] ss:$0 sm:$0xff] }
 0x9fc   : > { %5818 = vmatprep.subr.mxu0 %v6138_v7  ;;  %5851 = vmatprep.subr.mxu1 %v6138_v7 }
 0x9fd   : > { %5819 = vmatpush3.msra.mxu0 %v5243_v41  ;;  %5852 = vmatpush3.msra.mxu1 %v5267_v42 }
 0x9fe   : > { %5820 = vmatprep.subr.mxu0 %v6138_v7  ;;  %5853 = vmatprep.subr.mxu1 %v6138_v7 }
 0x9ff   : > { %5821 = vmatpush3.msra.mxu0 %v5242_v43  ;;  %5854 = vmatpush3.msra.mxu1 %v5266_v44 }
 0xa00   : > { %5822 = vmatprep.subr.mxu0 %v6138_v7  ;;  %5855 = vmatprep.subr.mxu1 %v6138_v7 }
 0xa01   : > { %5823 = vmatpush3.msra.mxu0 %v5241_v45  ;;  %5824 = vmatprep.mubr.msk.f32.mxu0 %vm6139_vm1, %v6138_v7 }
 0xa02   : > { %5856 = vmatpush3.msra.mxu1 %v5265_v46  ;;  %5857 = vmatprep.mubr.msk.f32.mxu1 %vm6139_vm1, %v6138_v7 }
 0xa03   : > { %5825 = vmatmul.mubr.msk.f32.vlgmr.msra.gmra.mxu0 %vm643_vm0, %v6811_v0  ;;  %5838 = vmatprep.subr.mxu0 %v6138_v7 }
 0xa04   : > { %5858 = vmatmul.mubr.msk.f32.vlgmr.msra.gmra.mxu1 %vm643_vm0, %v6811_v0  ;;  %5871 = vmatprep.subr.mxu1 %v6138_v7 }
 0xa05   : > { %5839 = vmatpush3.msra.mxu0 %v5252_v47  ;;  %5872 = vmatpush3.msra.mxu1 %v5276_v48 }
 0xa06   : > { %5840 = vmatprep.subr.mxu0 %v6138_v7  ;;  %5873 = vmatprep.subr.mxu1 %v6138_v7 }
 0xa07   : > { %5841 = vmatpush3.msra.mxu0 %v5251_v49  ;;  %5874 = vmatpush3.msra.mxu1 %v5275_v50 }
 0xa08   : > { %5842 = vmatprep.subr.mxu0 %v6138_v7  ;;  %5875 = vmatprep.subr.mxu1 %v6138_v7 }
 0xa09   : > { %5843 = vmatpush3.msra.mxu0 %v5250_v51  ;;  %5876 = vmatpush3.msra.mxu1 %v5274_v53 }
 0xa0a   : > { %5844 = vmatprep.subr.mxu0 %v6138_v7  ;;  %5877 = vmatprep.subr.mxu1 %v6138_v7 }
 0xa0b   : > { %5845 = vmatpush3.msra.mxu0 %v5249_v54  ;;  %5846 = vmatprep.mubr.msk.f32.mxu0 %vm6139_vm1, %v6138_v7 }
 0xa0c   : > { %5878 = vmatpush3.msra.mxu1 %v5273_v55  ;;  %5879 = vmatprep.mubr.msk.f32.mxu1 %vm6139_vm1, %v6138_v7 }
 0xa0d   : > { %5847 = vmatmul.mubr.msk.f32.vlgmr.msra.gmra.mxu0 %vm643_vm0, %v6811_v0  ;;  %5860 = vmatprep.subr.mxu0 %v6138_v7 }
 0xa0e   : > { %5880 = vmatmul.mubr.msk.f32.vlgmr.msra.gmra.mxu1 %vm643_vm0, %v6811_v0  ;;  %5861 = vmatpush3.msra.mxu0 %v5272_v56 }
 0xa0f   : > { %5862 = vmatprep.subr.mxu0 %v6138_v7  ;;  %5868 = vmatprep.mubr.msk.f32.mxu0 %vm6139_vm1, %v6138_v7 }
 0xa10   : > { %5863 = vmatpush3.msra.mxu0 %v5271_v58  ;;  %5893 = vmatprep.subr.mxu1 %v6138_v7 }
 0xa11   : > { %5864 = vmatprep.subr.mxu0 %v6138_v7  ;;  %5895 = vmatprep.mubr.msk.f32.mxu1 %vm6139_vm1, %v6138_v7 }
 0xa12   : > { %5865 = vmatpush3.msra.mxu0 %v5270_v59 }
 0xa13   : > { %5866 = vmatprep.subr.mxu0 %v6138_v7 }
 0xa14   : > { %5867 = vmatpush3.msra.mxu0 %v5269_v60 }
 0xa15   : > { %5869 = vmatmul.mubr.msk.f32.vlgmr.msra.gmra.mxu0 %vm643_vm0, %v6811_v0  ;;  %5882 = vmatprep.subr.mxu0 %v6138_v7 }
 0xa16   : > { %5883 = vmatpush3.msra.mxu0 %v5280_v61  ;;  %5890 = vmatprep.mubr.msk.f32.mxu0 %vm6139_vm1, %v6138_v7 }
 0xa17   : > { %5884 = vmatprep.subr.mxu0 %v6138_v7 }
 0xa18   : > { %5885 = vmatpush3.msra.mxu0 %v5279_v62 }
 0xa19   : > { %5886 = vmatprep.subr.mxu0 %v6138_v7 }
 0xa1a   : > { %5887 = vmatpush3.msra.mxu0 %v5278_v63 }
 0xa1b   : > { %5888 = vmatprep.subr.mxu0 %v6138_v7 }
 0xa1c   : > { %5889 = vmatpush3.msra.mxu0 %v5277_v1 }
 0xa1d   : > { %5891 = vmatmul.mubr.msk.f32.vlgmr.msra.gmra.mxu0 %vm643_vm0, %v6811_v0  ;;  %5903 = vmatprep.subr.mxu0 %v6138_v7  ;;  %v5258_v0 = vld [vmem:[%s7265_s8 + $0x5] ss:$0 sm:$0xff] }
 0xa1e   : > { %5905 = vmatprep.mubr.msk.f32.mxu0 %vm6139_vm1, %v6138_v7 }
 0xaa6   : > { %v2986_v2 = vpop.f32.mrf.mxu0  ;;  %v3126_v3 = vpop.f32.mrf.mxu1 }
 0xaa7   : > { %v2987_v14 = vadd.f32 %v5229_v10, %v2986_v2  ;;  %v3127_v22 = vadd.f32 %v5231_v18, %v3126_v3 }
 0xaa8   : > { %v5771_v4 = vpop.f32.mrf.mxu0  ;;  %v5793_v5 = vpop.f32.mrf.mxu1 }
 0xaaf   : > { %v3056_v8 = vpop.f32.mrf.mxu0 }
 0xab0   : > { %v3312_v9 = vpop.f32.mrf.mxu1  ;;  %v3057_v31 = vadd.f32 %v5230_v25, %v3056_v8 }
 0xab1   : > { %v3313_v11 = vadd.f32 %v5257_v6, %v3312_v9  ;;  %v5782_v12 = vpop.f32.mrf.mxu0 }
 0xab2   : > { %v5815_v13 = vpop.f32.mrf.mxu1 }
 0xab3   : > { %5894 = vmatpush3.xpose.msk.msra.mxu1 %vm1655_vm4, %v3313_v11 }
 0xab4   : > { %5898 = vmatprep.subr.mxu1 %v6138_v7 }
 0xab6   : > { %5896 = vmatmul.mubr.msk.f32.vlgmr.msra.gmra.mxu1 %vm1655_vm4, %v2987_v14 }
 0xab7   : > { %5900 = vmatprep.mubr.msk.f32.mxu1 %vm6139_vm1, %v6138_v7 }
 0xab9   : > { %v3196_v16 = vpop.f32.mrf.mxu0 }
 0xaba   : > { %v3452_v17 = vpop.f32.mrf.mxu1  ;;  %v3197_v39 = vadd.f32 %v5232_v34, %v3196_v16  ;;  %v5288_v34 = vld [vmem:[%s7266_s9 + $0x7] ss:$0 sm:$0xff] }
 0xabb   : > { %v3453_v19 = vadd.f32 %v5259_v15, %v3452_v17  ;;  %v5804_v20 = vpop.f32.mrf.mxu0 }
 0xabc   : > { %v5837_v21 = vpop.f32.mrf.mxu1 }
 0xabd   : > { %5904 = vmatpush3.xpose.msk.msra.mxu0 %vm1655_vm4, %v3453_v19 }
 0xabe   : > { %5913 = vmatprep.subr.mxu0 %v6138_v7 }
 0xac0   : > { %5906 = vmatmul.mubr.msk.f32.vlgmr.msra.gmra.mxu0 %vm1655_vm4, %v3127_v22 }
 0xac1   : > { %5915 = vmatprep.mubr.msk.f32.mxu0 %vm6139_vm1, %v6138_v7 }
 0xac3   : > { %v3382_v24 = vpop.f32.mrf.mxu0 }
 0xac4   : > { %v3383_v26 = vadd.f32 %v5258_v0, %v3382_v24  ;;  %v3638_v27 = vpop.f32.mrf.mxu1 }
 0xac5   : > { %v3639_v28 = vadd.f32 %v5285_v23, %v3638_v27  ;;  %v5826_v29 = vpop.f32.mrf.mxu0 }
 0xac6   : > { %v5859_v30 = vpop.f32.mrf.mxu1  ;;  %5899 = vmatpush3.xpose.msk.msra.mxu1 %vm1655_vm4, %v3383_v26  ;;  %v5287_v26 = vld [vmem:[%s7266_s9 + $0x6] ss:$0 sm:$0xff] }
 0xac7   : > { %5914 = vmatpush3.msra.mxu0 %v3639_v28  ;;  %5908 = vmatprep.subr.mxu1 %v6138_v7 }
 0xac8   : > { %5923 = vmatprep.subr.mxu0 %v6138_v7 }
 0xac9   : > { %5901 = vmatmul.mubr.msk.f32.vlgmr.msra.gmra.mxu1 %vm1655_vm4, %v3057_v31 }
 0xaca   : > { %5910 = vmatprep.mubr.msk.f32.mxu1 %vm6139_vm1, %v6138_v7 }
 0xacd   : > { %v3522_v33 = vpop.f32.mrf.mxu0 }
 0xace   : > { %v3523_v35 = vadd.f32 %v5260_v32, %v3522_v33  ;;  %v7064_v36 = vpop.f32.mrf.mxu1 }
 0xacf   : > { %v5848_v37 = vpop.f32.mrf.mxu0  ;;  %v3779_v29 = vadd.f32 %v5287_v26, %v7064_v36 }
 0xad0   : > { %v5881_v38 = vpop.f32.mrf.mxu1  ;;  %5909 = vmatpush3.xpose.msk.msra.mxu1 %vm1655_vm4, %v3523_v35 }
 0xad1   : > { %5918 = vmatprep.subr.mxu1 %v6138_v7 }
 0xad3   : > { %5911 = vmatmul.mubr.msk.f32.vlgmr.msra.gmra.mxu1 %vm1655_vm4, %v3197_v39 }
 0xad4   : > { %5920 = vmatprep.mubr.msk.f32.mxu1 %vm6139_vm1, %v6138_v7 }
 0xad5   : > { %v3708_v41 = vpop.f32.mrf.mxu0 }
 0xad6   : > { %v3709_v42 = vadd.f32 %v5286_v40, %v3708_v41  ;;  %v5305_v40 = vld [vmem:[%s7267_s10 + $0x20] sm:$0xff]  ;;  %v5306_v41 = vld [vmem:[%s7267_s10 + $0x28] sm:$0xff] }
 0xad7   : > { %v5870_v43 = vpop.f32.mrf.mxu0 }
 0xad8   : > { %5919 = vmatpush3.msra.mxu1 %v3709_v42  ;;  %v5307_v42 = vld [vmem:[%s7267_s10 + $0x30] sm:$0xff] }
 0xad9   : > { %5928 = vmatprep.subr.mxu1 %v6138_v7 }
 0xadd   : > { %v7075_v44 = vpop.f32.mrf.mxu0 }
 0xade   : > { %v3849_v37 = vadd.f32 %v5288_v34, %v7075_v44 }
 0xadf   : > { %v5892_v45 = vpop.f32.mrf.mxu0 }
 0xb76   : > { %v3924_v46 = vpop.f32.mrf.mxu1 }
 0xb77   : > { %v4156_v47 = vmul.f32 0.35355338, %v3924_v46 }
 0xb78   : > { %v5897_v48 = vpop.f32.mrf.mxu1 }
 0xb79   : > { %v4160_v49 = vadd.f32 %v6622_v52, %v4156_v47  ;;  %v5308_v47 = vld [vmem:[%s7267_s10 + $0x38] sm:$0xff] }
 0xb7b   : > { %v4164_v50 = vsel %vm1655_vm4, %v4160_v49, -inf }
 0xb7c   : > { %4165 = vmax.xlane.f32.xlu0 %v4164_v50 }
 0xb80   : > { %v4076_v51 = vpop.f32.mrf.mxu0 }
 0xb81   : > { %v4158_v53 = vmul.f32 0.35355338, %v4076_v51 }
 0xb82   : > { %v5907_v54 = vpop.f32.mrf.mxu0 }
 0xb83   : > { %v4162_v55 = vadd.f32 %v6622_v52, %v4158_v53 }
 0xb85   : > { %v4170_v56 = vsel %vm1655_vm4, %v4162_v55, -inf }
 0xb86   : > { %4171 = vmax.xlane.f32.xlu0 %v4170_v56 }
 0xb89   : > { %v4000_v58 = vpop.f32.mrf.mxu1 }
 0xb8a   : > { %v4157_v59 = vmul.f32 0.35355338, %v4000_v58 }
 0xb8b   : > { %v5902_v60 = vpop.f32.mrf.mxu1 }
 0xb8c   : > { %v4161_v61 = vadd.f32 %v6622_v52, %v4157_v59 }
 0xb8e   : > { %v4167_v62 = vsel %vm1655_vm4, %v4161_v61, -inf }
 0xb8f   : > { %4168 = vmax.xlane.f32.xlu1 %v4167_v62 }
 0xb93   : > { %v4152_v63 = vpop.f32.mrf.mxu1 }
 0xb94   : > { %v4159_v1 = vmul.f32 0.35355338, %v4152_v63 }
 0xb95   : > { %v5912_v2 = vpop.f32.mrf.mxu1 }
 0xb96   : > { %v4163_v3 = vadd.f32 %v6622_v52, %v4159_v1 }
 0xb98   : > { %v4173_v4 = vsel %vm1655_vm4, %v4163_v3, -inf }
 0xb99   : > { %4174 = vmax.xlane.f32.xlu1 %v4173_v4 }
 0xc05   : > { %v4166_v5 = vpop.xlane.xlu0 %4165 }
 0xc06   : > { %v4176_v6 = vsub.f32 %v4160_v49, %v4166_v5 }
 0xc08   : > { %v4180_v8 = vmul.f32 1.442695, %v4176_v6  ;;  %v5314_v6 = vld [vmem:[%s7268_s11 + $0x1] ss:$0 sm:$0xff] }
 0xc0a   : > { %6052 = vpow2.f32 %v4180_v8 }
 0xc0f   : > { %v4172_v9 = vpop.xlane.xlu0 %4171 }
 0xc10   : > { %v4178_v10 = vsub.f32 %v4162_v55, %v4172_v9 }
 0xc12   : > { %v4184_v11 = vmul.f32 1.442695, %v4178_v10 }
 0xc14   : > { %6054 = vpow2.f32 %v4184_v11 }
 0xc17   : > { %v6053_v12 = vpop.eup %6052 }
 0xc18   : > { %v4169_v13 = vpop.xlane.xlu1 %4168  ;;  %v4188_v14 = vsel %vm1655_vm4, %v6053_v12, 0.0 }
 0xc19   : > { %v4177_v15 = vsub.f32 %v4161_v61, %v4169_v13  ;;  %4189 = vadd.xlane.f32.xlu0 %v4188_v14 }
 0xc1b   : > { %v4182_v16 = vmul.f32 1.442695, %v4177_v15 }
 0xc1d   : > { %6056 = vpow2.f32 %v4182_v16  ;;  %v5322_v16 = vld [vmem:[%s7271_s14 + $0x38] sm:$0xff] }
 0xc21   : > { %v6055_v52 = vpop.eup %6054 }
 0xc22   : > { %v4175_v17 = vpop.xlane.xlu1 %4174  ;;  %v4194_v18 = vsel %vm1655_vm4, %v6055_v52, 0.0 }
 0xc23   : > { %v4179_v19 = vsub.f32 %v4163_v3, %v4175_v17  ;;  %4195 = vadd.xlane.f32.xlu0 %v4194_v18  ;;  %v5319_v17 = vld [vmem:[%s7271_s14 + $0x20] sm:$0xff]  ;;  %v5333_v18 = vld [vmem:[%s7273_s16 + $0x78] sm:$0xff] }
 0xc25   : > { %v4186_v20 = vmul.f32 1.442695, %v4179_v19  ;;  %v5332_v19 = vld [vmem:[%s7273_s16 + $0x70] sm:$0xff] }
 0xc27   : > { %6058 = vpow2.f32 %v4186_v20  ;;  %v5331_v20 = vld [vmem:[%s7273_s16 + $0x68] sm:$0xff] }
 0xc2a   : > { %v6057_v21 = vpop.eup %6056 }
 0xc2b   : > { %v4191_v22 = vsel %vm1655_vm4, %v6057_v21, 0.0 }
 0xc2c   : > { %4192 = vadd.xlane.f32.xlu1 %v4191_v22  ;;  %v5329_v22 = vld [vmem:[%s7273_s16 + $0x58] sm:$0xff] }
 0xc34   : > { %v6059_v0 = vpop.eup %6058 }
 0xc35   : > { %v4197_v23 = vsel %vm1655_vm4, %v6059_v0, 0.0 }
 0xc36   : > { %4198 = vadd.xlane.f32.xlu1 %v4197_v23 }
 0xca2   : > { %v4190_v24 = vpop.xlane.xlu0 %4189 }
 0xca3   : > { %6060 = vrcp.f32 %v4190_v24 }
 0xcac   : > { %v4196_v25 = vpop.xlane.xlu0 %4195 }
 0xcad   : > { %6062 = vrcp.f32 %v4196_v25 }
 0xcb0   : > { %v6061_v27 = vpop.eup %6060 }
 0xcb1   : > { %v4201_v28 = vmul.f32 %v6061_v27, %v6053_v12 }
 0xcb3   : > { %5916 = vmatmul.mubr.msk.f32.vlgmr.msra.gmra.mxu0 %vm1655_vm4, %v4201_v28 }
 0xcb4   : > { %5924 = vmatpush3.msra.mxu0 %v3779_v29  ;;  %5925 = vmatprep.mubr.msk.f32.mxu0 %vm6139_vm1, %v6138_v7 }
 0xcb5   : > { %v4193_v30 = vpop.xlane.xlu1 %4192  ;;  %5933 = vmatprep.subr.mxu0 %v6138_v7 }
 0xcb6   : > { %6064 = vrcp.f32 %v4193_v30  ;;  %v5317_v30 = vld [vmem:[%s7269_s12 + $0x1] ss:$0 sm:$0xff] }
 0xcba   : > { %v6063_v31 = vpop.eup %6062 }
 0xcbb   : > { %v4205_v32 = vmul.f32 %v6063_v31, %v6055_v52  ;;  %v5320_v52 = vld [vmem:[%s7271_s14 + $0x28] sm:$0xff] }
 0xcbd   : > { %5926 = vmatmul.mubr.msk.f32.vlgmr.msra.gmra.mxu0 %vm1655_vm4, %v4205_v32 }
 0xcbe   : > { %5935 = vmatprep.mubr.msk.f32.mxu0 %vm6139_vm1, %v6138_v7  ;;  %5934 = vmatpush3.msra.mxu0 %v5305_v40 }
 0xcbf   : > { %v4199_v33 = vpop.xlane.xlu1 %4198  ;;  %5943 = vmatprep.subr.mxu0 %v6138_v7 }
 0xcc0   : > { %6066 = vrcp.f32 %v4199_v33  ;;  %v5318_v33 = vld [vmem:[%s7270_s13 + $0x1] ss:$0 sm:$0xff] }
 0xcc3   : > { %v6065_v35 = vpop.eup %6064 }
 0xcc4   : > { %v4203_v36 = vmul.f32 %v6065_v35, %v6057_v21  ;;  %v5330_v21 = vld [vmem:[%s7273_s16 + $0x60] sm:$0xff] }
 0xcc6   : > { %5921 = vmatmul.mubr.msk.f32.vlgmr.msra.gmra.mxu1 %vm1655_vm4, %v4203_v36  ;;  %v5328_v36 = vld [vmem:[%s7273_s16 + $0x50] sm:$0xff] }
 0xcc7   : > { %5929 = vmatpush3.msra.mxu1 %v3849_v37  ;;  %5930 = vmatprep.mubr.msk.f32.mxu1 %vm6139_vm1, %v6138_v7  ;;  %v5327_v37 = vld [vmem:[%s7273_s16 + $0x48] sm:$0xff] }
 0xcc8   : > { %5938 = vmatprep.subr.mxu1 %v6138_v7 }
 0xccd   : > { %v6067_v38 = vpop.eup %6066 }
 0xcce   : > { %v4207_v39 = vmul.f32 %v6067_v38, %v6059_v0  ;;  %v5326_v38 = vld [vmem:[%s7273_s16 + $0x40] sm:$0xff] }
 0xcd0   : > { %5931 = vmatmul.mubr.msk.f32.vlgmr.msra.gmra.mxu1 %vm1655_vm4, %v4207_v39  ;;  %v5324_v39 = vld [vmem:[%s7272_s15 + $0x1] ss:$0 sm:$0xff] }
 0xcd1   : > { %5940 = vmatprep.mubr.msk.f32.mxu1 %vm6139_vm1, %v6138_v7  ;;  %5939 = vmatpush3.msra.mxu1 %v5306_v41 }
 0xcd2   : > { %5948 = vmatprep.subr.mxu1 %v6138_v7 }
 0xd73   : > { %v4277_v43 = vpop.f32.mrf.mxu0 }
 0xd74   : > { %5936 = vmatmul.mubr.msk.f32.vlgmr.msra.gmra.mxu0 %vm1655_vm4, %v4277_v43 }
 0xd75   : > { %v5917_v44 = vpop.f32.mrf.mxu0  ;;  %5944 = vmatpush3.msra.mxu0 %v5307_v42  ;;  %5945 = vmatprep.mubr.msk.f32.mxu0 %vm6139_vm1, %v6138_v7 }
 0xd76   : > { %5953 = vmatprep.subr.mxu0 %v6138_v7  ;;  %v5335_v44 = vld [vmem:[%s7274_s17 + $0x1] ss:$0 sm:$0xff] }
 0xd7d   : > { %v4423_v45 = vpop.f32.mrf.mxu0 }
 0xd7e   : > { %5946 = vmatmul.mubr.msk.f32.vlgmr.msra.gmra.mxu0 %vm1655_vm4, %v4423_v45 }
 0xd7f   : > { %v5927_v46 = vpop.f32.mrf.mxu0  ;;  %5961 = vmatprep.mubr.msk.f32.mxu0 %vm6139_vm1, %v6138_v7  ;;  %5954 = vmatpush3.msra.mxu0 %v5322_v16 }
 0xd80   : > { %5955 = vmatprep.subr.mxu0 %v6138_v7 }
 0xd86   : > { %v4350_v48 = vpop.f32.mrf.mxu1 }
 0xd87   : > { %5941 = vmatmul.mubr.msk.f32.vlgmr.msra.gmra.mxu1 %vm1655_vm4, %v4350_v48 }
 0xd88   : > { %v5922_v49 = vpop.f32.mrf.mxu1  ;;  %5949 = vmatpush3.msra.mxu1 %v5308_v47  ;;  %5950 = vmatprep.mubr.msk.f32.mxu1 %vm6139_vm1, %v6138_v7 }
 0xd89   : > { %5964 = vmatprep.subr.mxu1 %v6138_v7 }
 0xd90   : > { %v4496_v50 = vpop.f32.mrf.mxu1 }
 0xd91   : > { %5951 = vmatmul.mubr.msk.f32.vlgmr.msra.gmra.mxu1 %vm1655_vm4, %v4496_v50 }
 0xd92   : > { %v5932_v51 = vpop.f32.mrf.mxu1  ;;  %5980 = vmatprep.mubr.msk.f32.mxu1 %vm6139_vm1, %v6138_v7  ;;  %5965 = vmatpush3.msra.mxu1 %v5333_v18 }
 0xd93   : > { %5966 = vmatprep.subr.mxu1 %v6138_v7 }
 0xd94   : > { %5967 = vmatpush3.msra.mxu1 %v5332_v19 }
 0xd95   : > { %5968 = vmatprep.subr.mxu1 %v6138_v7 }
 0xd96   : > { %5969 = vmatpush3.msra.mxu1 %v5331_v20 }
 0xd97   : > { %5970 = vmatprep.subr.mxu1 %v6138_v7 }
 0xd98   : > { %5971 = vmatpush3.msra.mxu1 %v5330_v21 }
 0xd99   : > { %5972 = vmatprep.subr.mxu1 %v6138_v7 }
 0xd9a   : > { %5973 = vmatpush3.msra.mxu1 %v5329_v22 }
 0xd9b   : > { %5974 = vmatprep.subr.mxu1 %v6138_v7 }
 0xd9c   : > { %5975 = vmatpush3.msra.mxu1 %v5328_v36 }
 0xd9d   : > { %5976 = vmatprep.subr.mxu1 %v6138_v7 }
 0xd9e   : > { %5977 = vmatpush3.msra.mxu1 %v5327_v37 }
 0xd9f   : > { %5978 = vmatprep.subr.mxu1 %v6138_v7 }
 0xda0   : > { %5979 = vmatpush3.msra.mxu1 %v5326_v38 }
 0xe34   : > { %v4574_v53 = vpop.f32.mrf.mxu0 }
 0xe35   : > { %v4797_v61 = vsel %vm643_vm0, %v4574_v53, 0.0 }
 0xe36   : > { %v5937_v54 = vpop.f32.mrf.mxu0 }
 0xe3e   : > { %v4720_v55 = vpop.f32.mrf.mxu0 }
 0xe3f   : > { %v4800_v63 = vsel %vm643_vm0, %v4720_v55, 0.0 }
 0xe40   : > { %v5947_v56 = vpop.f32.mrf.mxu0 }
 0xe47   : > { %v4647_v58 = vpop.f32.mrf.mxu1 }
 0xe48   : > { %v4798_v60 = vsel %vm643_vm0, %v4647_v58, 0.0 }
 0xe49   : > { %v5942_v59 = vpop.f32.mrf.mxu1  ;;  %v4799_v62 = vadd.f32 %v4798_v60, %v4797_v61 }
 0xe4b   : > { %v4801_v2 = vadd.f32 %v4800_v63, %v4799_v62 }
 0xe51   : > { %v4793_v1 = vpop.f32.mrf.mxu1 }
 0xe52   : > { %v4802_v3 = vsel %vm643_vm0, %v4793_v1, 0.0  ;;  %v5337_v1 = vld [vmem:[%s7275_s18] ss:$0 sm:$0xff] }
 0xe53   : > { %v4803_v4 = vadd.f32 %v4802_v3, %v4801_v2  ;;  %v5952_v5 = vpop.f32.mrf.mxu1 }
 0xe55   : > { %v4804_v8 = vadd.f32 %v4803_v4, %v6767_v57  ;;  %v5321_v57 = vld [vmem:[%s7271_s14 + $0x30] sm:$0xff]  ;;  %v5338_v4 = vld [vmem:[%s7276_s19] ss:$0 sm:$0xff] }
 0xe56   : > { %5956 = vmatpush3.msra.mxu0 %v5321_v57 }
 0xe57   : > { %v7147_v9 = vadd.f32 %v5314_v6, %v4804_v8  ;;  %5957 = vmatprep.subr.mxu0 %v6138_v7 }
 0xe58   : > { %5958 = vmatpush3.msra.mxu0 %v5320_v52 }
 0xe59   : > { %v4818_v10 = vsel %vm643_vm0, %v7147_v9, 0.0  ;;  %5959 = vmatprep.subr.mxu0 %v6138_v7 }
 0xe5a   : > { %4819 = vadd.xlane.f32.xlu0 %v4818_v10  ;;  %5960 = vmatpush3.msra.mxu0 %v5319_v17 }
 0xee3   : > { %v4820_v11 = vpop.xlane.xlu0 %4819 }
 0xee4   : > { %v4821_v12 = vmul.f32 0.03125, %v4820_v11 }
 0xee6   : > { %v4822_v13 = vsub.f32 %v7147_v9, %v4821_v12 }
 0xee8   : > { %v4823_v14 = vmul.f32 %v4822_v13, %v4822_v13  ;;  %v4841_v31 = vmul.f32 %v5317_v30, %v4822_v13 }
 0xeea   : > { %v4824_v15 = vsel %vm643_vm0, %v4823_v14, 0.0 }
 0xeeb   : > { %4825 = vadd.xlane.f32.xlu1 %v4824_v15 }
 0xf74   : > { %v4826_v0 = vpop.xlane.xlu1 %4825 }
 0xf75   : > { %v4827_v23 = vmul.f32 0.032258064, %v4826_v0 }
 0xf77   : > { %6068 = vrsqrt.f32 %v4827_v23  ;;  %vm4830_vm10 = vcmp.eq.f32.partialorder %v4827_v23, inf  ;;  %v4833_v26 = vand.u32 2147483648, %v4827_v23  ;;  %vm4832_vm11 = vcmp.eq.f32.partialorder %v4827_v23, 0.0 }
 0xf84   : > { %v6069_v24 = vpop.eup %6068 }
 0xf85   : > { %v4829_v25 = vmul.f32 %v6069_v24, %v4827_v23 }
 0xf87   : > { %v4831_v27 = vsel %vm4830_vm10, %v4827_v23, %v4829_v25 }
 0xf88   : > { %v4834_v28 = vsel %vm4832_vm11, %v4833_v26, %v4831_v27 }
 0xf89   : > { %v4842_v29 = vadd.f32 1e-06, %v4834_v28 }
 0xf8b   : > { %6070 = vrcp.f32 %v4842_v29 }
 0xf98   : > { %v6071_v32 = vpop.eup %6070 }
 0xf99   : > { %v4844_v34 = vmul.f32 %v6071_v32, %v4841_v31 }
 0xf9b   : > { %v4851_v35 = vadd.f32 %v5318_v33, %v4844_v34 }
 0xf9d   : > { %5962 = vmatmul.mubr.msk.f32.vlgmr.msra.gmra.mxu0 %vm643_vm0, %v4851_v35 }
0x105d   : > { %v4934_v40 = vpop.f32.mrf.mxu0 }
0x105e   : > { %v4935_v41 = vadd.f32 %v5324_v39, %v4934_v40 }
0x105f   : > { %v5963_v42 = vpop.f32.mrf.mxu0 }
0x1060   : > { %v4938_v43 = vmax.f32 %v4935_v41, 0.0 }
0x1062   : > { %5981 = vmatmul.mubr.msk.f32.vlgmr.msra.gmra.mxu1 %vm2758_vm7, %v4938_v43 }
0x1122   : > { %v5025_v45 = vpop.f32.mrf.mxu1 }
0x1123   : > { %v5026_v46 = vadd.f32 %v5335_v44, %v5025_v45 }
0x1124   : > { %v5982_v47 = vpop.f32.mrf.mxu1 }
0x1125   : > { %v5029_v7 = vadd.f32 %v5026_v46, %v7147_v9 }
0x1127   : > { %v5032_v48 = vsel %vm643_vm0, %v5029_v7, 0.0 }
0x1128   : > { %5033 = vadd.xlane.f32.xlu0 %v5032_v48 }
0x11b1   : > { %v5034_v49 = vpop.xlane.xlu0 %5033 }
0x11b2   : > { %v5035_v50 = vmul.f32 0.03125, %v5034_v49 }
0x11b4   : > { %v5036_v51 = vsub.f32 %v5029_v7, %v5035_v50 }
0x11b6   : > { %v5037_v53 = vmul.f32 %v5036_v51, %v5036_v51  ;;  %v5055_v2 = vmul.f32 %v5337_v1, %v5036_v51 }
0x11b8   : > { %v5038_v54 = vsel %vm643_vm0, %v5037_v53, 0.0 }
0x11b9   : > { %5039 = vadd.xlane.f32.xlu1 %v5038_v54 }
0x1242   : > { %v5040_v55 = vpop.xlane.xlu1 %5039 }
0x1243   : > { %v5041_v56 = vmul.f32 0.032258064, %v5040_v55 }
0x1245   : > { %6072 = vrsqrt.f32 %v5041_v56  ;;  %vm5044_vm12 = vcmp.eq.f32.partialorder %v5041_v56, inf  ;;  %v5047_v60 = vand.u32 2147483648, %v5041_v56  ;;  %vm5046_vm13 = vcmp.eq.f32.partialorder %v5041_v56, 0.0 }
0x1252   : > { %v6073_v58 = vpop.eup %6072 }
0x1253   : > { %v5043_v59 = vmul.f32 %v6073_v58, %v5041_v56 }
0x1255   : > { %v5045_v61 = vsel %vm5044_vm12, %v5041_v56, %v5043_v59 }
0x1256   : > { %v5048_v62 = vsel %vm5046_vm13, %v5047_v60, %v5045_v61 }
0x1257   : > { %v5056_v63 = vadd.f32 1e-06, %v5048_v62 }
0x1259   : > { %6074 = vrcp.f32 %v5056_v63 }
0x1266   : > { %v6075_v3 = vpop.eup %6074 }
0x1267   : > { %v5058_v5 = vmul.f32 %v6075_v3, %v5055_v2 }
0x1269   : > { %v5065_v6 = vadd.f32 %v5338_v4, %v5058_v5 }
0x126b   : > { %5066 = vst.msk [vmem:[%s631_s28] sm:$0xff] %vm643_vm0, %v5065_v6 }
0x126c   : > { %6089 = shalt.err (!%p6086_p3)
}
0x126d   : > { %s6090_s5 = scalar_lea.hbm %s5079_s6, 128  ;;  %s6094_s21 = scalar_lea.hbm %s7277_s20, 256 }
0x126e   : > { %p6091_p4 = scmp.ne.s32.totalorder %s5079_s6, %s6090_s5  ;;  %p6095_p9 = scmp.lt.s32.totalorder %s5079_s6, %s7277_s20 }
0x126f   : > { %p6096_p10 = scmp.lt.s32.totalorder %s6094_s21, %s6090_s5 }
0x1270   : > { %p6092_p7 = pnand %p6091_p4, %p6284_p5 }
0x1271   : > { %p6097_p11 = por %p6096_p10, %p6095_p9 }
0x1272   : > { %p6093_p8 = pneg %p6092_p7 }
0x1274   : > { %p6098_p12 = pnand %p6097_p11, %p6093_p8 }
0x1276   : > { %6101 = shalt.err (!%p6098_p12)
}
0x1277   : > { %5983 = dma.vmem_to_hbm [thread:$0]  (%p6284_p5), %s5082_s29, 128, %s5079_s6, %s5068_s27  }
0x1278 PF: > { %s7310_s23 = sld [smem:[#allocation7_spill]] }
0x1279   : > { %s7311_s30 = sld [smem:[#allocation5_spill]] }
0x127e   : > { %p5989_p13 = scmp.ge.s32.totalorder %s7310_s23, 2 }
0x127f   : > { %s5093_s2 = sand.u32 1, %s7311_s30  }
0x1280   : > { %p5986_p0 = pnand %p5989_p13, %p6288_p6  ;;  %s5094_s3 = scalar_lea.sflag [#allocation3], %s5093_s2 }
0x1282   : > { %p5987_p1 = pneg %p5986_p0 }
0x1284   : > { %6119 = dma.done.wait (%p5987_p1), %s5094_s3, 128  }
0x1285   : > { %6121 = vsyncadd (%p5987_p1), %s5094_s3, 4294967168  ;;  %s7313_s24 = sld [smem:[#allocation8_spill]]  ;;  %s7316_s1 = smov %s6128_s22 }
0x1286   : > { %s7314_s5 = sld [smem:[#allocation6_spill]] }
0x1287   : > { %s7315_s23 = sld [smem:[#allocation9_spill]] }
0x128b   : > { %p30_p2 = scmp.ge.s32.totalorder %s7313_s24, 4  }
0x128c   : > { %s7317_s22 = smov %s7314_s5 }
0x128d   :  { %32 = sbr.rel (!%p30_p2) target bundleno = 11 (0xb), region = 154 }
0x1292   :  { %5099 = vsyncpa [#allocation3], 1 }
0x1293   :  { %5101 = vsyncpa [#allocation3 + $0x1], 1 }

</bundles_post_ra>
